<compile_context>
chip_gen: v5e
topology: v5e:2x2
jax: 0.10.0
libtpu: 0.0.40
codegen_flags: <defaults>
</compile_context>

<pallas_src>
import jax
import jax.numpy as jnp
from jax.experimental import pallas as pl
from jax.experimental.pallas import tpu as pltpu


def _round_up(x, m):
    return (x + m - 1) // m * m


def _mpnn_fused_kernel(h0_ref, e_ref, s_ref, at_ref,
                       w1_ref, b1_ref, w2_ref, b2_ref,
                       exp_ref, red_ref, wcat_ref, bcat_ref,
                       h_ref, acc_ref):
    """Fused (layer x edge-tile) MPNN step.

    grid = (layer, edge_tile).  h_ref (the output block, constant block index) holds
    the hidden state VMEM-resident across the whole grid; acc_ref accumulates the
    mean-aggregated message of the current layer across edge tiles.
    """
    l = pl.program_id(0)
    t = pl.program_id(1)
    last_t = pl.num_programs(1) - 1
    Hp = h_ref.shape[1]

    # very first grid step: seed the hidden state with the input node features
    @pl.when(jnp.logical_and(l == 0, t == 0))
    def _():
        h_ref[...] = h0_ref[...]

    # start of every layer: clear the aggregation accumulator
    @pl.when(t == 0)
    def _():
        acc_ref[...] = jnp.zeros_like(acc_ref)

    h = h_ref[...]                                                        # (N, Hp) = h_l

    # ---- edge network: Linear -> ReLU -> Linear, lane-dense (tile_E, H*H)
    te = jnp.maximum(
        jnp.dot(e_ref[...], w1_ref[...], preferred_element_type=jnp.float32)
        + b1_ref[...], 0.0)
    w_flat = jnp.dot(te, w2_ref[...], preferred_element_type=jnp.float32) + b2_ref[...]

    # ---- NNConv message passing (aggregator='mean', bias=False)
    # gather source node features for this edge tile (dense one-hot matmul)
    h_src = jnp.dot(s_ref[...], h, preferred_element_type=jnp.float32)    # (tE, Hp)
    # msg[e, j] = sum_i h_src[e, i] * w_flat[e, i*H + j]   (kept lane-dense, MXU only)
    h_rep = jnp.dot(h_src, exp_ref[...], preferred_element_type=jnp.float32)       # (tE, H*H)
    msg = jnp.dot(h_rep * w_flat, red_ref[...], preferred_element_type=jnp.float32)  # (tE, Hp)
    # mean aggregation onto destination nodes: acc += A[:, tile] @ msg  (A passed transposed)
    acc_ref[...] += jax.lax.dot_general(
        at_ref[...], msg, (((0,), (0,)), ((), ())),
        preferred_element_type=jnp.float32)                               # (N, Hp)

    # ---- end of layer: ReLU + fused GRU cell update (PyTorch gate order r, z, n)
    @pl.when(t == last_t)
    def _():
        m = jnp.maximum(acc_ref[...], 0.0)                                # F.relu
        g = jnp.dot(jnp.concatenate([m, h], axis=1), wcat_ref[...],
                    preferred_element_type=jnp.float32) + bcat_ref[...]   # (N, 6*Hp)
        gi_r, gi_z, gi_n = g[:, :Hp], g[:, Hp:2 * Hp], g[:, 2 * Hp:3 * Hp]
        gh_r, gh_z, gh_n = g[:, 3 * Hp:4 * Hp], g[:, 4 * Hp:5 * Hp], g[:, 5 * Hp:]
        r = jax.nn.sigmoid(gi_r + gh_r)
        z = jax.nn.sigmoid(gi_z + gh_z)
        n = jnp.tanh(gi_n + r * gh_n)
        h_ref[...] = (1.0 - z) * n + z * h


def mpnn_forward(h_node, h_edge, src, dst, params, n_layers, tile_e=None):
    """Equivalent of MPNN.forward(g, h_node, h_edge), fused into one pallas_call."""
    N, H = h_node.shape
    E, He = h_edge.shape
    Hp = _round_up(H, 128)                       # lane-dense padded hidden size

    # --- dense graph operators (glue, built once host-side) ---------------------------
    S = jax.nn.one_hot(src, N, dtype=jnp.float32)                 # (E, N) src gather
    onehot_dst = jax.nn.one_hot(dst, N, dtype=jnp.float32)        # (E, N)
    deg = jnp.sum(onehot_dst, axis=0)                             # (N,)
    A_T = onehot_dst / jnp.maximum(deg, 1.0)[None, :]             # (E, N) mean reducer^T

    # --- edge tiling (pad E with zero edges; exact: zero rows contribute nothing) -----
    if tile_e is None:
        tile_e = min(_round_up(E, 8), 512)
    tile_e = max(8, _round_up(tile_e, 8))
    E_pad = _round_up(E, tile_e)
    if E_pad != E:
        pad = ((0, E_pad - E), (0, 0))
        h_edge = jnp.pad(h_edge, pad)
        S = jnp.pad(S, pad)
        A_T = jnp.pad(A_T, pad)
    n_tiles = E_pad // tile_e

    # --- lane-dense constants:  msg = ((h_src @ Expand) * w_flat) @ R -----------------
    eye = jnp.eye(H, dtype=jnp.float32)
    expand = jnp.pad(jnp.repeat(eye, H, axis=1), ((0, Hp - H), (0, 0)))   # (Hp, H*H)
    reduce_r = jnp.pad(jnp.tile(eye, (H, 1)), ((0, 0), (0, Hp - H)))      # (H*H, Hp)

    # --- padded, fused GRU weights:  [m | h] @ Wcat + bcat = [gi | gh] -----------------
    def pad_gate_w(w):                                            # (H, 3H) -> (Hp, 3Hp)
        out = jnp.zeros((Hp, 3 * Hp), jnp.float32)
        for k in range(3):
            out = out.at[:H, k * Hp:k * Hp + H].set(w[:, k * H:(k + 1) * H])
        return out

    def pad_gate_b(b):                                            # (1, 3H) -> (1, 3Hp)
        out = jnp.zeros((1, 3 * Hp), jnp.float32)
        for k in range(3):
            out = out.at[:, k * Hp:k * Hp + H].set(b[:, k * H:(k + 1) * H])
        return out

    wih_p, whh_p = pad_gate_w(params["wih_t"]), pad_gate_w(params["whh_t"])
    w_cat = jnp.zeros((2 * Hp, 6 * Hp), jnp.float32)
    w_cat = w_cat.at[:Hp, :3 * Hp].set(wih_p)
    w_cat = w_cat.at[Hp:, 3 * Hp:].set(whh_p)
    b_cat = jnp.concatenate([pad_gate_b(params["bih"]), pad_gate_b(params["bhh"])], axis=1)

    h0 = jnp.pad(h_node, ((0, 0), (0, Hp - H)))                   # (N, Hp)

    def resident(shape):          # whole array, DMA'd once (block index never changes)
        return pl.BlockSpec(shape, lambda l, t: (0, 0))

    def edge_tiled(shape):        # streamed per edge tile, pipelined by Pallas
        return pl.BlockSpec(shape, lambda l, t: (t, 0))

    out = pl.pallas_call(
        _mpnn_fused_kernel,
        out_shape=jax.ShapeDtypeStruct((N, Hp), jnp.float32),
        grid=(n_layers, n_tiles),
        in_specs=[
            resident((N, Hp)),                 # h0
            edge_tiled((tile_e, He)),          # h_edge tile
            edge_tiled((tile_e, N)),           # S tile
            edge_tiled((tile_e, N)),           # A_T tile
            resident(params["w1"].shape),      # w1
            resident(params["b1"].shape),      # b1
            resident(params["w2"].shape),      # w2
            resident(params["b2"].shape),      # b2
            resident(expand.shape),            # Expand
            resident(reduce_r.shape),          # R
            resident(w_cat.shape),             # fused GRU weight
            resident(b_cat.shape),             # fused GRU bias
        ],
        out_specs=pl.BlockSpec((N, Hp), lambda l, t: (0, 0)),
        scratch_shapes=[pltpu.VMEM((N, Hp), jnp.float32)],
        compiler_params=pltpu.CompilerParams(
            dimension_semantics=("arbitrary", "arbitrary")),
    )(h0, h_edge, S, A_T,
      params["w1"], params["b1"], params["w2"], params["b2"],
      expand, reduce_r, w_cat, b_cat)

    return out[:, :H]


def mpnn_forward_ref(h_node, h_edge, src, dst, params, n_layers):
    """Pure-JAX reference (matches the PyTorch MPNN forward)."""
    N, H = h_node.shape
    S = jax.nn.one_hot(src, N, dtype=jnp.float32)
    onehot_dst = jax.nn.one_hot(dst, N, dtype=jnp.float32)
    deg = jnp.sum(onehot_dst, axis=0)
    A = onehot_dst.T / jnp.maximum(deg, 1.0)[:, None]

    h = h_node
    for _ in range(n_layers):
        t = jnp.maximum(h_edge @ params["w1"] + params["b1"], 0.0)
        w_edge = (t @ params["w2"] + params["b2"]).reshape(-1, H, H)
        h_src = S @ h
        msg = jnp.einsum("ei,eij->ej", h_src, w_edge)
        m = jnp.maximum(A @ msg, 0.0)
        gi = m @ params["wih_t"] + params["bih"]
        gh = h @ params["whh_t"] + params["bhh"]
        r = jax.nn.sigmoid(gi[:, :H] + gh[:, :H])
        z = jax.nn.sigmoid(gi[:, H:2 * H] + gh[:, H:2 * H])
        n = jnp.tanh(gi[:, 2 * H:] + r * gh[:, 2 * H:])
        h = (1.0 - z) * n + z * h
    return h


def init_params(key, n_node_hidden, n_edge_hidden):
    H, He = n_node_hidden, n_edge_hidden
    ks = jax.random.split(key, 8)
    scale = 0.1
    # edge network: Linear(He, He) -> ReLU -> Linear(He, H*H); weights stored (in, out)
    w1 = scale * jax.random.normal(ks[0], (He, He), jnp.float32)
    b1 = scale * jax.random.normal(ks[1], (1, He), jnp.float32)
    w2 = scale * jax.random.normal(ks[2], (He, H * H), jnp.float32)
    b2 = scale * jax.random.normal(ks[3], (1, H * H), jnp.float32)
    # GRU(H, H): weight_ih_l0 (3H, H), weight_hh_l0 (3H, H) -> pre-transposed to (H, 3H)
    wih_t = scale * jax.random.normal(ks[4], (H, 3 * H), jnp.float32)
    whh_t = scale * jax.random.normal(ks[5], (H, 3 * H), jnp.float32)
    bih = scale * jax.random.normal(ks[6], (1, 3 * H), jnp.float32)
    bhh = scale * jax.random.normal(ks[7], (1, 3 * H), jnp.float32)
    return dict(w1=w1, b1=b1, w2=w2, b2=b2,
                wih_t=wih_t, whh_t=whh_t, bih=bih, bhh=bhh)


if __name__ == "__main__":
    key = jax.random.PRNGKey(0)
    N, E = 16, 32                  # nodes, edges
    H, He = 32, 16                 # n_node_hidden, n_edge_hidden
    n_layers = 3

    k_h, k_e, k_src, k_dst, k_p = jax.random.split(key, 5)
    h_node = jax.random.normal(k_h, (N, H), jnp.float32)
    h_edge = jax.random.normal(k_e, (E, He), jnp.float32)
    src = jax.random.randint(k_src, (E,), 0, N)
    dst = jax.random.randint(k_dst, (E,), 0, N)
    params = init_params(k_p, H, He)

    # tile_e=16 -> 2 edge tiles, exercising the accumulate / finalize path
    out = mpnn_forward(h_node, h_edge, src, dst, params, n_layers, tile_e=16)
    out = jax.block_until_ready(out)

    ref = mpnn_forward_ref(h_node, h_edge, src, dst, params, n_layers)
    assert out.shape == (N, H)
    assert jnp.allclose(out, ref, rtol=2e-4, atol=2e-4), "mismatch vs JAX reference"
    print("KERNEL_OK")
</pallas_src>

<mosaic_0001>
module attributes {stable_mosaic.version = 11 : i64} {
  func.func @_mpnn_fused_kernel(%arg0: i32, %arg1: i32, %arg2: memref<16x128xf32, #tpu.memory_space<vmem>>, %arg3: memref<16x16xf32, #tpu.memory_space<vmem>>, %arg4: memref<16x16xf32, #tpu.memory_space<vmem>>, %arg5: memref<16x16xf32, #tpu.memory_space<vmem>>, %arg6: memref<16x16xf32, #tpu.memory_space<vmem>>, %arg7: memref<1x16xf32, #tpu.memory_space<vmem>>, %arg8: memref<16x1024xf32, #tpu.memory_space<vmem>>, %arg9: memref<1x1024xf32, #tpu.memory_space<vmem>>, %arg10: memref<128x1024xf32, #tpu.memory_space<vmem>>, %arg11: memref<1024x128xf32, #tpu.memory_space<vmem>>, %arg12: memref<256x768xf32, #tpu.memory_space<vmem>>, %arg13: memref<1x768xf32, #tpu.memory_space<vmem>>, %arg14: memref<16x128xf32, #tpu.memory_space<vmem>>, %arg15: memref<16x128xf32, #tpu.memory_space<vmem>>) attributes {dimension_semantics = [#tpu.dimension_semantics<arbitrary>, #tpu.dimension_semantics<arbitrary>], iteration_bounds = array<i64: 3, 2>, scalar_prefetch = 0 : i64, scratch_operands = 1 : i64, tpu.core_type = #tpu.core_type<tc>, window_params = [{pipeline_mode = #tpu.pipeline_mode<synchronous>, transform_indices = @transform_0, window_bounds = array<i64: 16, 128>}, {transform_indices = @transform_1, window_bounds = array<i64: 16, 16>}, {transform_indices = @transform_2, window_bounds = array<i64: 16, 16>}, {transform_indices = @transform_3, window_bounds = array<i64: 16, 16>}, {pipeline_mode = #tpu.pipeline_mode<synchronous>, transform_indices = @transform_4, window_bounds = array<i64: 16, 16>}, {pipeline_mode = #tpu.pipeline_mode<synchronous>, transform_indices = @transform_5, window_bounds = array<i64: 1, 16>}, {pipeline_mode = #tpu.pipeline_mode<synchronous>, transform_indices = @transform_6, window_bounds = array<i64: 16, 1024>}, {pipeline_mode = #tpu.pipeline_mode<synchronous>, transform_indices = @transform_7, window_bounds = array<i64: 1, 1024>}, {pipeline_mode = #tpu.pipeline_mode<synchronous>, transform_indices = @transform_8, window_bounds = array<i64: 128, 1024>}, {pipeline_mode = #tpu.pipeline_mode<synchronous>, transform_indices = @transform_9, window_bounds = array<i64: 1024, 128>}, {pipeline_mode = #tpu.pipeline_mode<synchronous>, transform_indices = @transform_10, window_bounds = array<i64: 256, 768>}, {pipeline_mode = #tpu.pipeline_mode<synchronous>, transform_indices = @transform_11, window_bounds = array<i64: 1, 768>}, {pipeline_mode = #tpu.pipeline_mode<synchronous>, transform_indices = @transform_12, window_bounds = array<i64: 16, 128>}]} {
    %c0_i32 = arith.constant 0 : i32
    %0 = arith.cmpi eq, %arg0, %c0_i32 : i32
    %c0_i32_0 = arith.constant 0 : i32
    %1 = arith.cmpi eq, %arg1, %c0_i32_0 : i32
    %2 = arith.andi %0, %1 : i1
    %3 = arith.extui %2 : i1 to i32
    %c0_i32_1 = arith.constant 0 : i32
    %4 = arith.cmpi ne, %3, %c0_i32_1 : i32
    scf.if %4 {
      %c0_34 = arith.constant 0 : index
      %c0_35 = arith.constant 0 : index
      %37 = vector.load %arg2[%c0_34, %c0_35] : memref<16x128xf32, #tpu.memory_space<vmem>>, vector<16x128xf32>
      %c0_36 = arith.constant 0 : index
      %c0_37 = arith.constant 0 : index
      %38 = vector.load %arg14[%c0_36, %c0_37] : memref<16x128xf32, #tpu.memory_space<vmem>>, vector<16x128xf32>
      tpu.vector_store %arg14[%c0_36, %c0_37], %37 {strides = array<i32>} : memref<16x128xf32, #tpu.memory_space<vmem>>, vector<16x128xf32>,
    } else {
    }
    %c0_i32_2 = arith.constant 0 : i32
    %5 = arith.cmpi eq, %arg1, %c0_i32_2 : i32
    %6 = arith.extui %5 : i1 to i32
    %c0_i32_3 = arith.constant 0 : i32
    %7 = arith.cmpi ne, %6, %c0_i32_3 : i32
    scf.if %7 {
      %cst_34 = arith.constant 0.000000e+00 : f32
      %37 = vector.broadcast %cst_34 : f32 to vector<16x128xf32>
      %c0_35 = arith.constant 0 : index
      %c0_36 = arith.constant 0 : index
      %38 = vector.load %arg15[%c0_35, %c0_36] : memref<16x128xf32, #tpu.memory_space<vmem>>, vector<16x128xf32>
      tpu.vector_store %arg15[%c0_35, %c0_36], %37 {strides = array<i32>} : memref<16x128xf32, #tpu.memory_space<vmem>>, vector<16x128xf32>,
    } else {
    }
    %c0 = arith.constant 0 : index
    %c0_4 = arith.constant 0 : index
    %8 = vector.load %arg14[%c0, %c0_4] : memref<16x128xf32, #tpu.memory_space<vmem>>, vector<16x128xf32>
    %c0_5 = arith.constant 0 : index
    %c0_6 = arith.constant 0 : index
    %9 = vector.load %arg3[%c0_5, %c0_6] : memref<16x16xf32, #tpu.memory_space<vmem>>, vector<16x16xf32>
    %c0_7 = arith.constant 0 : index
    %c0_8 = arith.constant 0 : index
    %10 = vector.load %arg6[%c0_7, %c0_8] : memref<16x16xf32, #tpu.memory_space<vmem>>, vector<16x16xf32>
    %cst = arith.constant dense<0.000000e+00> : vector<16x16xf32>
    %11 = tpu.matmul %9, %10, %cst {dimension_numbers = #tpu.dot_dimension_numbers<[1], [0], [0], [1], [0, 0, 1, 1], [], []>} : vector<16x16xf32>, vector<16x16xf32>, vector<16x16xf32> -> vector<16x16xf32>
    %c0_9 = arith.constant 0 : index
    %c0_10 = arith.constant 0 : index
    %12 = vector.load %arg7[%c0_9, %c0_10] : memref<1x16xf32, #tpu.memory_space<vmem>>, vector<1x16xf32>
    %13 = vector.broadcast %12 : vector<1x16xf32> to vector<16x16xf32>
    %14 = arith.addf %11, %13 : vector<16x16xf32>
    %cst_11 = arith.constant 0.000000e+00 : f32
    %15 = vector.broadcast %cst_11 : f32 to vector<16x16xf32>
    %16 = arith.maximumf %14, %15 : vector<16x16xf32>
    %c0_12 = arith.constant 0 : index
    %c0_13 = arith.constant 0 : index
    %17 = vector.load %arg8[%c0_12, %c0_13] : memref<16x1024xf32, #tpu.memory_space<vmem>>, vector<16x1024xf32>
    %cst_14 = arith.constant dense<0.000000e+00> : vector<16x1024xf32>
    %18 = tpu.matmul %16, %17, %cst_14 {dimension_numbers = #tpu.dot_dimension_numbers<[1], [0], [0], [1], [0, 0, 1, 1], [], []>} : vector<16x16xf32>, vector<16x1024xf32>, vector<16x1024xf32> -> vector<16x1024xf32>
    %c0_15 = arith.constant 0 : index
    %c0_16 = arith.constant 0 : index
    %19 = vector.load %arg9[%c0_15, %c0_16] : memref<1x1024xf32, #tpu.memory_space<vmem>>, vector<1x1024xf32>
    %20 = vector.broadcast %19 : vector<1x1024xf32> to vector<16x1024xf32>
    %21 = arith.addf %18, %20 : vector<16x1024xf32>
    %c0_17 = arith.constant 0 : index
    %c0_18 = arith.constant 0 : index
    %22 = vector.load %arg4[%c0_17, %c0_18] : memref<16x16xf32, #tpu.memory_space<vmem>>, vector<16x16xf32>
    %cst_19 = arith.constant dense<0.000000e+00> : vector<16x128xf32>
    %23 = tpu.matmul %22, %8, %cst_19 {dimension_numbers = #tpu.dot_dimension_numbers<[1], [0], [0], [1], [0, 0, 1, 1], [], []>} : vector<16x16xf32>, vector<16x128xf32>, vector<16x128xf32> -> vector<16x128xf32>
    %c0_20 = arith.constant 0 : index
    %c0_21 = arith.constant 0 : index
    %24 = vector.load %arg10[%c0_20, %c0_21] : memref<128x1024xf32, #tpu.memory_space<vmem>>, vector<128x1024xf32>
    %cst_22 = arith.constant dense<0.000000e+00> : vector<16x1024xf32>
    %25 = tpu.matmul %23, %24, %cst_22 {dimension_numbers = #tpu.dot_dimension_numbers<[1], [0], [0], [1], [0, 0, 1, 1], [], []>} : vector<16x128xf32>, vector<128x1024xf32>, vector<16x1024xf32> -> vector<16x1024xf32>
    %26 = arith.mulf %25, %21 : vector<16x1024xf32>
    %c0_23 = arith.constant 0 : index
    %c0_24 = arith.constant 0 : index
    %27 = vector.load %arg11[%c0_23, %c0_24] : memref<1024x128xf32, #tpu.memory_space<vmem>>, vector<1024x128xf32>
    %cst_25 = arith.constant dense<0.000000e+00> : vector<16x128xf32>
    %28 = tpu.matmul %26, %27, %cst_25 {dimension_numbers = #tpu.dot_dimension_numbers<[1], [0], [0], [1], [0, 0, 1, 1], [], []>} : vector<16x1024xf32>, vector<1024x128xf32>, vector<16x128xf32> -> vector<16x128xf32>
    %c0_26 = arith.constant 0 : index
    %c0_27 = arith.constant 0 : index
    %29 = vector.load %arg15[%c0_26, %c0_27] : memref<16x128xf32, #tpu.memory_space<vmem>>, vector<16x128xf32>
    %c0_28 = arith.constant 0 : index
    %c0_29 = arith.constant 0 : index
    %30 = vector.load %arg5[%c0_28, %c0_29] : memref<16x16xf32, #tpu.memory_space<vmem>>, vector<16x16xf32>
    %cst_30 = arith.constant dense<0.000000e+00> : vector<16x128xf32>
    %31 = tpu.matmul %30, %28, %cst_30 {dimension_numbers = #tpu.dot_dimension_numbers<[0], [0], [1], [1], [0, 1, 1, 1], [], []>} : vector<16x16xf32>, vector<16x128xf32>, vector<16x128xf32> -> vector<16x128xf32>
    %32 = arith.addf %29, %31 : vector<16x128xf32>
    %c0_31 = arith.constant 0 : index
    %c0_32 = arith.constant 0 : index
    %33 = vector.load %arg15[%c0_31, %c0_32] : memref<16x128xf32, #tpu.memory_space<vmem>>, vector<16x128xf32>
    tpu.vector_store %arg15[%c0_31, %c0_32], %32 {strides = array<i32>} : memref<16x128xf32, #tpu.memory_space<vmem>>, vector<16x128xf32>,
    %c1_i32 = arith.constant 1 : i32
    %34 = arith.cmpi eq, %arg1, %c1_i32 : i32
    %35 = arith.extui %34 : i1 to i32
    %c0_i32_33 = arith.constant 0 : i32
    %36 = arith.cmpi ne, %35, %c0_i32_33 : i32
    scf.if %36 {
      %c0_34 = arith.constant 0 : index
      %c0_35 = arith.constant 0 : index
      %37 = vector.load %arg15[%c0_34, %c0_35] : memref<16x128xf32, #tpu.memory_space<vmem>>, vector<16x128xf32>
      %cst_36 = arith.constant 0.000000e+00 : f32
      %38 = vector.broadcast %cst_36 : f32 to vector<16x128xf32>
      %39 = arith.maximumf %37, %38 : vector<16x128xf32>
      %40 = tpu.concatenate %39, %8 in 1 : vector<16x128xf32>, vector<16x128xf32> -> vector<16x256xf32>
      %c0_37 = arith.constant 0 : index
      %c0_38 = arith.constant 0 : index
      %41 = vector.load %arg12[%c0_37, %c0_38] : memref<256x768xf32, #tpu.memory_space<vmem>>, vector<256x768xf32>
      %cst_39 = arith.constant dense<0.000000e+00> : vector<16x768xf32>
      %42 = tpu.matmul %40, %41, %cst_39 {dimension_numbers = #tpu.dot_dimension_numbers<[1], [0], [0], [1], [0, 0, 1, 1], [], []>} : vector<16x256xf32>, vector<256x768xf32>, vector<16x768xf32> -> vector<16x768xf32>
      %c0_40 = arith.constant 0 : index
      %c0_41 = arith.constant 0 : index
      %43 = vector.load %arg13[%c0_40, %c0_41] : memref<1x768xf32, #tpu.memory_space<vmem>>, vector<1x768xf32>
      %44 = vector.broadcast %43 : vector<1x768xf32> to vector<16x768xf32>
      %45 = arith.addf %42, %44 : vector<16x768xf32>
      %46 = vector.extract_strided_slice %45 {offsets = [0, 0], sizes = [16, 128], strides = [1, 1]} : vector<16x768xf32> to vector<16x128xf32>
      %47 = vector.extract_strided_slice %45 {offsets = [0, 128], sizes = [16, 128], strides = [1, 1]} : vector<16x768xf32> to vector<16x128xf32>
      %48 = vector.extract_strided_slice %45 {offsets = [0, 256], sizes = [16, 128], strides = [1, 1]} : vector<16x768xf32> to vector<16x128xf32>
      %49 = vector.extract_strided_slice %45 {offsets = [0, 384], sizes = [16, 128], strides = [1, 1]} : vector<16x768xf32> to vector<16x128xf32>
      %50 = vector.extract_strided_slice %45 {offsets = [0, 512], sizes = [16, 128], strides = [1, 1]} : vector<16x768xf32> to vector<16x128xf32>
      %51 = vector.extract_strided_slice %45 {offsets = [0, 640], sizes = [16, 128], strides = [1, 1]} : vector<16x768xf32> to vector<16x128xf32>
      %52 = arith.addf %46, %49 : vector<16x128xf32>
      %53 = arith.negf %52 : vector<16x128xf32>
      %54 = math.exp %53 : vector<16x128xf32>
      %cst_42 = arith.constant 1.000000e+00 : f32
      %55 = vector.broadcast %cst_42 : f32 to vector<16x128xf32>
      %56 = arith.addf %55, %54 : vector<16x128xf32>
      %57 = arith.divf %55, %56 : vector<16x128xf32>
      %58 = arith.addf %47, %50 : vector<16x128xf32>
      %59 = arith.negf %58 : vector<16x128xf32>
      %60 = math.exp %59 : vector<16x128xf32>
      %cst_43 = arith.constant 1.000000e+00 : f32
      %61 = vector.broadcast %cst_43 : f32 to vector<16x128xf32>
      %62 = arith.addf %61, %60 : vector<16x128xf32>
      %63 = arith.divf %61, %62 : vector<16x128xf32>
      %64 = arith.mulf %57, %51 : vector<16x128xf32>
      %65 = arith.addf %48, %64 : vector<16x128xf32>
      %66 = math.tanh %65 : vector<16x128xf32>
      %cst_44 = arith.constant 1.000000e+00 : f32
      %67 = vector.broadcast %cst_44 : f32 to vector<16x128xf32>
      %68 = arith.subf %67, %63 : vector<16x128xf32>
      %69 = arith.mulf %68, %66 : vector<16x128xf32>
      %70 = arith.mulf %63, %8 : vector<16x128xf32>
      %71 = arith.addf %69, %70 : vector<16x128xf32>
      %c0_45 = arith.constant 0 : index
      %c0_46 = arith.constant 0 : index
      %72 = vector.load %arg14[%c0_45, %c0_46] : memref<16x128xf32, #tpu.memory_space<vmem>>, vector<16x128xf32>
      tpu.vector_store %arg14[%c0_45, %c0_46], %71 {strides = array<i32>} : memref<16x128xf32, #tpu.memory_space<vmem>>, vector<16x128xf32>,
    } else {
    }
    return
  }
  func.func @transform_0(%arg0: i32, %arg1: i32) -> (i32, i32) {
    %c0_i32 = arith.constant 0 : i32
    %c0_i32_0 = arith.constant 0 : i32
    %c0_i32_1 = arith.constant 0 : i32
    return %c0_i32, %c0_i32_0 : i32, i32
  }
  func.func @transform_1(%arg0: i32, %arg1: i32) -> (i32, i32) {
    %c0_i32 = arith.constant 0 : i32
    %c0_i32_0 = arith.constant 0 : i32
    return %arg1, %c0_i32 : i32, i32
  }
  func.func @transform_2(%arg0: i32, %arg1: i32) -> (i32, i32) {
    %c0_i32 = arith.constant 0 : i32
    %c0_i32_0 = arith.constant 0 : i32
    return %arg1, %c0_i32 : i32, i32
  }
  func.func @transform_3(%arg0: i32, %arg1: i32) -> (i32, i32) {
    %c0_i32 = arith.constant 0 : i32
    %c0_i32_0 = arith.constant 0 : i32
    return %arg1, %c0_i32 : i32, i32
  }
  func.func @transform_4(%arg0: i32, %arg1: i32) -> (i32, i32) {
    %c0_i32 = arith.constant 0 : i32
    %c0_i32_0 = arith.constant 0 : i32
    %c0_i32_1 = arith.constant 0 : i32
    return %c0_i32, %c0_i32_0 : i32, i32
  }
  func.func @transform_5(%arg0: i32, %arg1: i32) -> (i32, i32) {
    %c0_i32 = arith.constant 0 : i32
    %c0_i32_0 = arith.constant 0 : i32
    %c0_i32_1 = arith.constant 0 : i32
    return %c0_i32, %c0_i32_0 : i32, i32
  }
  func.func @transform_6(%arg0: i32, %arg1: i32) -> (i32, i32) {
    %c0_i32 = arith.constant 0 : i32
    %c0_i32_0 = arith.constant 0 : i32
    %c0_i32_1 = arith.constant 0 : i32
    return %c0_i32, %c0_i32_0 : i32, i32
  }
  func.func @transform_7(%arg0: i32, %arg1: i32) -> (i32, i32) {
    %c0_i32 = arith.constant 0 : i32
    %c0_i32_0 = arith.constant 0 : i32
    %c0_i32_1 = arith.constant 0 : i32
    return %c0_i32, %c0_i32_0 : i32, i32
  }
  func.func @transform_8(%arg0: i32, %arg1: i32) -> (i32, i32) {
    %c0_i32 = arith.constant 0 : i32
    %c0_i32_0 = arith.constant 0 : i32
    %c0_i32_1 = arith.constant 0 : i32
    return %c0_i32, %c0_i32_0 : i32, i32
  }
  func.func @transform_9(%arg0: i32, %arg1: i32) -> (i32, i32) {
    %c0_i32 = arith.constant 0 : i32
    %c0_i32_0 = arith.constant 0 : i32
    %c0_i32_1 = arith.constant 0 : i32
    return %c0_i32, %c0_i32_0 : i32, i32
  }
  func.func @transform_10(%arg0: i32, %arg1: i32) -> (i32, i32) {
    %c0_i32 = arith.constant 0 : i32
    %c0_i32_0 = arith.constant 0 : i32
    %c0_i32_1 = arith.constant 0 : i32
    return %c0_i32, %c0_i32_0 : i32, i32
  }
  func.func @transform_11(%arg0: i32, %arg1: i32) -> (i32, i32) {
    %c0_i32 = arith.constant 0 : i32
    %c0_i32_0 = arith.constant 0 : i32
    %c0_i32_1 = arith.constant 0 : i32
    return %c0_i32, %c0_i32_0 : i32, i32
  }
  func.func @transform_12(%arg0: i32, %arg1: i32) -> (i32, i32) {
    %c0_i32 = arith.constant 0 : i32
    %c0_i32_0 = arith.constant 0 : i32
    %c0_i32_1 = arith.constant 0 : i32
    return %c0_i32, %c0_i32_0 : i32, i32
  }
}

</mosaic_0001>

<bundles_post_ra>
// kernel: tpu_custom_call.1
= control target key start
LH: loop header
LB: loop body
LE: loop exit
PB: predicated region body
PF: predicated region fallthrough
CT: control target
= control target key end

     0   :  { %s3014_s0 = inlined_call_operand.vmem [shape: f32[16,128], index: 0, kind: input, shape index: {}]   ;;  %s3015_s1 = inlined_call_operand.vmem [shape: f32[32,16], index: 1, kind: input, shape index: {}]   ;;  %s3016_s2 = inlined_call_operand.vmem [shape: f32[32,16], index: 2, kind: input, shape index: {}]   ;;  %s3017_s3 = inlined_call_operand.vmem [shape: f32[32,16], index: 3, kind: input, shape index: {}]   ;;  %s3018_s4 = inlined_call_operand.vmem [shape: f32[16,16], index: 4, kind: input, shape index: {}]   ;;  %s3019_s5 = inlined_call_operand.vmem [shape: f32[1,16], index: 5, kind: input, shape index: {}]   ;;  %s3020_s6 = inlined_call_operand.hbm [shape: f32[16,1024], index: 6, kind: input, shape index: {}]   ;;  %s3021_s7 = inlined_call_operand.vmem [shape: f32[1,1024], index: 7, kind: input, shape index: {}]   ;;  %s3022_s8 = inlined_call_operand.hbm [shape: f32[128,1024], index: 8, kind: input, shape index: {}]   ;;  %s3023_s9 = inlined_call_operand.hbm [shape: f32[1024,128], index: 9, kind: input, shape index: {}]   ;;  %s3024_s10 = inlined_call_operand.hbm [shape: f32[256,768], index: 10, kind: input, shape index: {}]   ;;  %s3025_s11 = inlined_call_operand.vmem [shape: f32[1,768], index: 11, kind: input, shape index: {}]   ;;  %s3026_s12 = inlined_call_operand.hbm [shape: f32[16,128], index: 12, kind: output, shape index: {}]  }
   0x1   :  { %3029 = sst [smem:[#allocation17_spill]] %s3020_s6 }
   0x2   :  { %3030 = sst [smem:[#allocation18_spill]] %s3022_s8 }
   0x3   :  { %3031 = sst [smem:[#allocation19_spill]] %s3023_s9 }
   0x4   :  { %3032 = sst [smem:[#allocation20_spill]] %s3025_s11 }
   0x5   :  { %3033 = sst [smem:[#allocation21_spill]] %s3026_s12 }
   0x6   :  { %17 = vsyncpa [#allocation4], 0 }
   0x7   :  { %18 = vsyncpa [#allocation7], 0 }
   0x8   :  { %19 = vsyncpa [#allocation10], 0 }
   0x9   :  { %20 = vsyncpa [#allocation5], 0  ;;  %s2713_s21 = smov 0   ;;  %s2715_s22 = smov 0  }
   0xa   :  { %s2717_s23 = smov 0   ;;  %s2719_s24 = smov 0  }
   0xb   :  { %s2721_s25 = smov 0  }
   0xc LB: > { %3034 = sst [smem:[#allocation16_spill]] %s2632_s25  ;;  %s3027_s26 = sadd.s32 4294967295, %s2632_s25   ;;  %s2632_s25 = sphi %s2721_s25, %s26_s25   ;;  %s2628_s24 = sphi %s2719_s24, %s3049_s24   ;;  %s2624_s23 = sphi %s2717_s23, %s3048_s23   ;;  %s2620_s22 = sphi %s2715_s22, %s3047_s22   ;;  %s2616_s21 = sphi %s2713_s21, %s3046_s21  }
   0xd   : > { %p2260_p0 = scmp.ge.s32.totalorder %s2632_s25, 1  ;;  %p331_p1 = scmp.lt.s32.totalorder %s2632_s25, 7 }
   0xe   : > { %p2743_p2 = scmp.eq.s32.totalorder %s3027_s26, 0  ;;  %s3036_s8 = sld [smem:[#allocation18_spill]] }
   0xf   : > { %p2750_p3 = pnand %p2260_p0, %p331_p1  ;;  %s2634_s14 = smov [#allocation6]  }
  0x10   : > { %s370_s15 = sshll.u32 %s2634_s14, 4  ;;  %s2635_s17 = smov 1024   ;;  %s371_s15 = int_to_ptr.vmem [resolvable:$true] %s370_s15 }
  0x11   : > { %p2331_p4 = pneg %p2750_p3  ;;  %s2636_s18 = smov 64  }
  0x12   : > { %s35_s19 = sadd.s32 1, %s2624_s23  ;;  %s38_s20 = sadd.s32 1, %s2628_s24 }
  0x13   : > { %p2758_p5 = pnand %p2743_p2, %p2331_p4  ;;  %p36_p6 = scmp.ge.s32.totalorder %s35_s19, 2 }
  0x14   : > { %s368_s30 = sshll.u32 %s3036_s8, 4  ;;  %s3039_s6 = sld [smem:[#allocation17_spill]]  ;;  %s369_s30 = int_to_ptr.hbm [resolvable:$true] %s368_s30 }
  0x15   : > { %2337 = dma.hbm_to_vmem [thread:$0]  (!%p2758_p5), %s369_s30, 16384, %s371_s15, [#allocation7], %s2635_s17, %s2635_s17, %s2636_s18  }
  0x16   : > { %s3051_s19 = smov (%p36_p6, %s35_s19), 0  ;;  %s3053_s20 = smov (!%p36_p6, %s38_s20), %s2628_s24 }
  0x17   : > { %s2637_s14 = smov [#allocation3]   ;;  %s3040_s9 = sld [smem:[#allocation19_spill]] }
  0x18   : > { %s353_s8 = sshll.u32 %s2637_s14, 4  ;;  %p40_p7 = scmp.ge.s32.totalorder %s3053_s20, 3  ;;  %s354_s8 = int_to_ptr.vmem [resolvable:$true] %s353_s8 }
  0x19   : > { %s2638_s30 = smov [#allocation8]   ;;  %s2639_s28 = smov 128  }
  0x1a   : > { %s351_s26 = sshll.u32 %s3039_s6, 4  ;;  %s3055_s20 = smov (%p40_p7, %s3053_s20), 0  ;;  %s352_s26 = int_to_ptr.hbm [resolvable:$true] %s351_s26 }
  0x1b   : > { %2334 = dma.hbm_to_vmem [thread:$0]  (!%p2758_p5), %s352_s26, 2048, %s354_s8, [#allocation4], %s2635_s17, %s2635_s17, %s2636_s18  }
  0x1c   : > { %s384_s15 = sshll.u32 %s2638_s30, 4  ;;  %s2640_s29 = smov 8   ;;  %s385_s15 = int_to_ptr.vmem [resolvable:$true] %s384_s15 }
  0x1d   : > { %s382_s11 = sshll.u32 %s3040_s9, 4  ;;  %s396_s12 = sshll.u32 %s3024_s10, 4  ;;  %s383_s11 = int_to_ptr.hbm [resolvable:$true] %s382_s11  ;;  %s397_s12 = int_to_ptr.hbm [resolvable:$true] %s396_s12 }
  0x1e   : > { %2340 = dma.hbm_to_vmem [thread:$0]  (!%p2758_p5), %s383_s11, 16384, %s385_s15, [#allocation7], %s2639_s28, %s2639_s28, %s2640_s29  }
  0x1f   : > { %s2641_s25 = smov [#allocation9]   ;;  %s2642_s8 = smov 768  }
  0x20   : > { %s398_s9 = sshll.u32 %s2641_s25, 4  ;;  %s2643_s26 = smov 48   ;;  %s399_s9 = int_to_ptr.vmem [resolvable:$true] %s398_s9 }
  0x21   : > { %2343 = dma.hbm_to_vmem [thread:$0]  (!%p2758_p5), %s397_s12, 24576, %s399_s9, [#allocation10], %s2642_s8, %s2642_s8, %s2643_s26  }
  0x22   : > { %444 = sbr.rel (%p2750_p3) target bundleno = 1095 (0x447), region = 68 }
  0x27   : > { %2599 = dma.done.wait (%p2743_p2), [#allocation4], 2048  }
  0x28   : > { %2601 = vsyncadd (%p2743_p2), [#allocation4], 4294965248 }
  0x29   : > { %2603 = dma.done.wait (%p2743_p2), [#allocation7], 32768  }
  0x2a   : > { %2605 = vsyncadd (%p2743_p2), [#allocation7], 4294934528 }
  0x2b   : > { %2607 = dma.done.wait (%p2743_p2), [#allocation10], 24576  }
  0x2c   : > { %2609 = vsyncadd (%p2743_p2), [#allocation10], 4294942720  ;;  %s2271_s6 = sshll.u32 %s2616_s21, 1  ;;  %p525_p8 = scmp.eq.s32.totalorder %s2620_s22, 0 }
  0x2d   : > { %p508_p9 = scmp.lt.s32.totalorder %s2271_s6, 3  ;;  %p526_p10 = scmp.eq.s32.totalorder %s2616_s21, 0 }
  0x2f   : > { %s3057_s6 = smov (!%p508_p9, %s2271_s6), 3  ;;  %p527_p11 = pnand %p526_p10, %p525_p8 }
  0x30   : > { %s2272_s9 = sshll.u32 %s3057_s6, 3 }
  0x31   : > { %s511_s16 = scalar_lea.vmem %s3015_s1, %s2272_s9  ;;  %s2809_s30 = scalar_lea.vmem %s3016_s2, %s2272_s9 }
  0x32   : > { %s2814_s28 = scalar_lea.vmem %s3017_s3, %s2272_s9  ;;  %530 = sbr.rel (%p527_p11) target bundleno = 58 (0x3a), region = 88 }
  0x37   : > { %v531_v0 = vld [vmem:[%s3014_s0] sm:$0xff]  ;;  %v532_v1 = vld [vmem:[%s3014_s0 + $0x8] sm:$0xff] }
  0x38   : > { %533 = vst [vmem:[#allocation11] sm:$0xff] %v531_v0 }
  0x39   : > { %534 = vst [vmem:[#allocation11 + $0x8] sm:$0xff] %v532_v1 }
  0x3a PF: > { %p2277_p12 = scmp.ne.s32.totalorder %s2616_s21, 0 }
  0x3c   : > { %537 = sbr.rel (%p2277_p12) target bundleno = 68 (0x44), region = 92 }
  0x41   : > { %v2644_v2 = vmov 0.0  }
  0x42   : > { %538 = vst [vmem:[#allocation2] sm:$0xff] %v2644_v2 }
  0x43   : > { %539 = vst [vmem:[#allocation2 + $0x8] sm:$0xff] %v2644_v2 }
  0x44 PF: > { %v545_v3 = vld [vmem:[%s3018_s4 + $0x8] sm:$0xff]  ;;  %v544_v4 = vld [vmem:[%s3018_s4] sm:$0xff]  ;;  %vm550_vm0 = vcmask 130048   ;;  %v590_v7 = vld [vmem:[#allocation3 + $0x40] sm:$0xff]  ;;  %p2300_p13 = scmp.ne.s32.totalorder %s2616_s21, 1 }
  0x45   : > { %571 = vmatpush.msra.mxu0 %v545_v3  ;;  %2309 = vmatpush.msra.mxu3 %v545_v3  ;;  %v542_v5 = vld [vmem:[%s511_s16] sm:$0xff]  ;;  %v543_v6 = vld [vmem:[%s511_s16 + $0x8] sm:$0xff]  ;;  %v591_v8 = vld [vmem:[#allocation3 + $0x48] sm:$0xff]  ;;  %s3041_s18 = sld [smem:[#allocation20_spill]] (!%p2300_p13) }
  0x46   : > { %v592_v9 = vld [vmem:[#allocation3 + $0x50] sm:$0xff]  ;;  %636 = vmatpush.msra.mxu1 %v590_v7  ;;  %659 = vmatpush.msra.mxu2 %v591_v8  ;;  %v593_v10 = vld [vmem:[#allocation3 + $0x58] sm:$0xff]  ;;  %v582_v11 = vld [vmem:[#allocation3] sm:$0xff] }
  0x47   : > { %572 = vmatpush.msra.mxu0 %v544_v4  ;;  %2310 = vmatpush.msra.mxu3 %v544_v4  ;;  %v583_v12 = vld [vmem:[#allocation3 + $0x8] sm:$0xff]  ;;  %v584_v13 = vld [vmem:[#allocation3 + $0x10] sm:$0xff]  ;;  %v585_v14 = vld [vmem:[#allocation3 + $0x18] sm:$0xff] }
  0x48   : > { %2278 = vmatmul.msk.f32.vlgmr.msra.gmra.mxu0 %vm550_vm0, %v542_v5  ;;  %2279 = vmatmul.msk.f32.vlgmr.msra.gmra.mxu3 %vm550_vm0, %v543_v6  ;;  %v594_v15 = vld [vmem:[#allocation3 + $0x60] sm:$0xff]  ;;  %v595_v16 = vld [vmem:[#allocation3 + $0x68] sm:$0xff]  ;;  %v596_v17 = vld [vmem:[#allocation3 + $0x70] sm:$0xff] }
  0x49   : > { %682 = vmatpush.msrb.mxu3 %v592_v9  ;;  %705 = vmatpush.msrb.mxu0 %v593_v10  ;;  %v597_v18 = vld [vmem:[#allocation3 + $0x78] sm:$0xff]  ;;  %v586_v19 = vld [vmem:[#allocation3 + $0x20] sm:$0xff]  ;;  %v587_v20 = vld [vmem:[#allocation3 + $0x28] sm:$0xff] }
  0x4a   : > { %637 = vmatpush.msra.mxu1 %v582_v11  ;;  %660 = vmatpush.msra.mxu2 %v583_v12  ;;  %v588_v21 = vld [vmem:[#allocation3 + $0x30] sm:$0xff]  ;;  %v589_v22 = vld [vmem:[#allocation3 + $0x38] sm:$0xff]  ;;  %v2834_v27 = vld [vmem:[#allocation11 + $0x8] sm:$0xff] }
  0x4b   : > { %683 = vmatpush.msrb.mxu3 %v584_v13  ;;  %706 = vmatpush.msrb.mxu0 %v585_v14  ;;  %v2409_v23 = vld [vmem:[%s3019_s5] ss:$0 sm:$0xff]  ;;  %v2840_v29 = vld [vmem:[#allocation11] sm:$0xff]  ;;  %v958_v33 = vld [vmem:[#allocation6 + $0x3c8] sm:$0xff] }
  0x4c   : > { %728 = vmatpush.msrb.mxu1 %v594_v15  ;;  %751 = vmatpush.msrb.mxu2 %v595_v16  ;;  %v957_v32 = vld [vmem:[#allocation6 + $0x3c0] sm:$0xff]  ;;  %v959_v34 = vld [vmem:[#allocation6 + $0x3d0] sm:$0xff]  ;;  %v950_v36 = vld [vmem:[#allocation6 + $0x388] sm:$0xff] }
  0x4d   : > { %774 = vmatpush.msra.mxu3 %v596_v17  ;;  %797 = vmatpush.msra.mxu0 %v597_v18  ;;  %v949_v35 = vld [vmem:[#allocation6 + $0x380] sm:$0xff]  ;;  %v951_v37 = vld [vmem:[#allocation6 + $0x390] sm:$0xff]  ;;  %v942_v39 = vld [vmem:[#allocation6 + $0x348] sm:$0xff] }
  0x4e   : > { %729 = vmatpush.msrb.mxu1 %v586_v19  ;;  %752 = vmatpush.msrb.mxu2 %v587_v20  ;;  %v941_v38 = vld [vmem:[#allocation6 + $0x340] sm:$0xff]  ;;  %v943_v40 = vld [vmem:[#allocation6 + $0x350] sm:$0xff]  ;;  %v960_v41 = vld [vmem:[#allocation6 + $0x3d8] sm:$0xff] }
  0x4f   : > { %775 = vmatpush.msra.mxu3 %v588_v21  ;;  %798 = vmatpush.msra.mxu0 %v589_v22  ;;  %v933_v42 = vld [vmem:[#allocation6 + $0x300] sm:$0xff]  ;;  %v934_v43 = vld [vmem:[#allocation6 + $0x308] sm:$0xff]  ;;  %v935_v44 = vld [vmem:[#allocation6 + $0x310] sm:$0xff] }
  0x50   : > { %v952_v45 = vld [vmem:[#allocation6 + $0x398] sm:$0xff]  ;;  %v925_v46 = vld [vmem:[#allocation6 + $0x2c0] sm:$0xff]  ;;  %v926_v47 = vld [vmem:[#allocation6 + $0x2c8] sm:$0xff] }
  0x51   : > { %v927_v48 = vld [vmem:[#allocation6 + $0x2d0] sm:$0xff]  ;;  %v944_v49 = vld [vmem:[#allocation6 + $0x358] sm:$0xff]  ;;  %v917_v50 = vld [vmem:[#allocation6 + $0x280] sm:$0xff] }
  0x52   : > { %v918_v51 = vld [vmem:[#allocation6 + $0x288] sm:$0xff]  ;;  %v919_v52 = vld [vmem:[#allocation6 + $0x290] sm:$0xff]  ;;  %v936_v53 = vld [vmem:[#allocation6 + $0x318] sm:$0xff] }
  0x53   : > { %v909_v54 = vld [vmem:[#allocation6 + $0x240] sm:$0xff]  ;;  %v910_v55 = vld [vmem:[#allocation6 + $0x248] sm:$0xff]  ;;  %v911_v56 = vld [vmem:[#allocation6 + $0x250] sm:$0xff] }
  0x54   : > { %v928_v57 = vld [vmem:[#allocation6 + $0x2d8] sm:$0xff]  ;;  %v806_v59 = vld [vmem:[%s2809_s30] sm:$0xff]  ;;  %v901_v62 = vld [vmem:[#allocation6 + $0x200] sm:$0xff] }
  0x55   : > { %v920_v58 = vld [vmem:[#allocation6 + $0x298] sm:$0xff]  ;;  %v902_v63 = vld [vmem:[#allocation6 + $0x208] sm:$0xff]  ;;  %v903_v0 = vld [vmem:[#allocation6 + $0x210] sm:$0xff] }
  0x56   : > { %v912_v60 = vld [vmem:[#allocation6 + $0x258] sm:$0xff]  ;;  %v893_v2 = vld [vmem:[#allocation6 + $0x1c0] sm:$0xff]  ;;  %v894_v3 = vld [vmem:[#allocation6 + $0x1c8] sm:$0xff] }
  0x57   : > { %v807_v61 = vld [vmem:[%s2809_s30 + $0x8] sm:$0xff]  ;;  %v895_v4 = vld [vmem:[#allocation6 + $0x1d0] sm:$0xff]  ;;  %v885_v6 = vld [vmem:[#allocation6 + $0x180] sm:$0xff] }
  0x58   : > { %v904_v1 = vld [vmem:[#allocation6 + $0x218] sm:$0xff]  ;;  %v886_v7 = vld [vmem:[#allocation6 + $0x188] sm:$0xff]  ;;  %v887_v8 = vld [vmem:[#allocation6 + $0x190] sm:$0xff] }
  0x59   : > { %v896_v5 = vld [vmem:[#allocation6 + $0x1d8] sm:$0xff]  ;;  %v877_v10 = vld [vmem:[#allocation6 + $0x140] sm:$0xff]  ;;  %v878_v11 = vld [vmem:[#allocation6 + $0x148] sm:$0xff] }
  0x5a   : > { %v888_v9 = vld [vmem:[#allocation6 + $0x198] sm:$0xff]  ;;  %v879_v12 = vld [vmem:[#allocation6 + $0x150] sm:$0xff]  ;;  %v869_v14 = vld [vmem:[#allocation6 + $0x100] sm:$0xff] }
  0x5b   : > { %v880_v13 = vld [vmem:[#allocation6 + $0x158] sm:$0xff]  ;;  %v870_v15 = vld [vmem:[#allocation6 + $0x108] sm:$0xff]  ;;  %v871_v16 = vld [vmem:[#allocation6 + $0x110] sm:$0xff] }
  0x5c   : > { %v872_v17 = vld [vmem:[#allocation6 + $0x118] sm:$0xff]  ;;  %v861_v18 = vld [vmem:[#allocation6 + $0xc0] sm:$0xff]  ;;  %v862_v19 = vld [vmem:[#allocation6 + $0xc8] sm:$0xff] }
  0x5d   : > { %v863_v20 = vld [vmem:[#allocation6 + $0xd0] sm:$0xff]  ;;  %v864_v21 = vld [vmem:[#allocation6 + $0xd8] sm:$0xff]  ;;  %v853_v22 = vld [vmem:[#allocation6 + $0x80] sm:$0xff] }
  0xc5   : > { %v574_v24 = vpop.f32.mrf.mxu0 }
  0xc6   : > { %v575_v25 = vadd.f32 %v2409_v23, %v574_v24  ;;  %v855_v24 = vld [vmem:[#allocation6 + $0x90] sm:$0xff] }
  0xc8   : > { %v580_v26 = vmax.f32 %v575_v25, 0.0  ;;  %v856_v25 = vld [vmem:[#allocation6 + $0x98] sm:$0xff] }
  0xca   : > { %2280 = vmatmul.msk.f32.vlgmr.msra.gmra.mxu1 %vm550_vm0, %v580_v26  ;;  %2282 = vmatmul.msk.f32.vlgmr.msra.gmra.mxu2 %vm550_vm0, %v580_v26 }
  0xcb   : > { %2284 = vmatmul.msk.f32.vlgmr.msrb.gmra.mxu3 %vm550_vm0, %v580_v26  ;;  %2286 = vmatmul.msk.f32.vlgmr.msrb.gmra.mxu0 %vm550_vm0, %v580_v26  ;;  %v577_v28 = vpop.f32.mrf.mxu3 }
  0xcc   : > { %v578_v30 = vadd.f32 %v2409_v23, %v577_v28  ;;  %828 = vmatpush.msra.mxu1 %v2834_v27  ;;  %965 = vmatpush.msra.mxu2 %v957_v32  ;;  %v854_v23 = vld [vmem:[#allocation6 + $0x88] sm:$0xff]  ;;  %v837_v32 = vld [vmem:[#allocation6] sm:$0xff] }
  0xcd   : > { %988 = vmatpush.msrb.mxu3 %v958_v33  ;;  %1011 = vmatpush.msrb.mxu0 %v959_v34  ;;  %v846_v28 = vld [vmem:[#allocation6 + $0x48] sm:$0xff]  ;;  %v839_v34 = vld [vmem:[#allocation6 + $0x10] sm:$0xff] }
  0xce   : > { %v581_v31 = vmax.f32 %v578_v30, 0.0  ;;  %829 = vmatpush.msra.mxu1 %v2840_v29  ;;  %966 = vmatpush.msra.mxu2 %v949_v35  ;;  %v847_v30 = vld [vmem:[#allocation6 + $0x50] sm:$0xff]  ;;  %v838_v33 = vld [vmem:[#allocation6 + $0x8] sm:$0xff]  ;;  %v840_v35 = vld [vmem:[#allocation6 + $0x18] sm:$0xff] }
  0xcf   : > { %989 = vmatpush.msrb.mxu3 %v950_v36  ;;  %1012 = vmatpush.msrb.mxu0 %v951_v37  ;;  %v961_v36 = vld [vmem:[#allocation6 + $0x3e0] sm:$0xff]  ;;  %v962_v37 = vld [vmem:[#allocation6 + $0x3e8] sm:$0xff] }
  0xd0   : > { %967 = vmatpush.msra.mxu2 %v941_v38  ;;  %v963_v38 = vld [vmem:[#allocation6 + $0x3f0] sm:$0xff] }
  0xd1   : > { %990 = vmatpush.msrb.mxu3 %v942_v39  ;;  %1013 = vmatpush.msrb.mxu0 %v943_v40  ;;  %v964_v39 = vld [vmem:[#allocation6 + $0x3f8] sm:$0xff]  ;;  %v953_v40 = vld [vmem:[#allocation6 + $0x3a0] sm:$0xff] }
  0xd2   : > { %2281 = vmatmul.msk.f32.gmra.mxu1 %vm550_vm0, %v581_v31  ;;  %2283 = vmatmul.msk.f32.gmra.mxu2 %vm550_vm0, %v581_v31 }
  0xd3   : > { %2285 = vmatmul.msk.f32.gmra.mxu3 %vm550_vm0, %v581_v31  ;;  %2287 = vmatmul.msk.f32.gmra.mxu0 %vm550_vm0, %v581_v31 }
  0xd4   : > { %968 = vmatpush.msra.mxu2 %v933_v42  ;;  %991 = vmatpush.msrb.mxu3 %v934_v43  ;;  %v955_v42 = vld [vmem:[#allocation6 + $0x3b0] sm:$0xff]  ;;  %v956_v43 = vld [vmem:[#allocation6 + $0x3b8] sm:$0xff] }
  0xd5   : > { %1014 = vmatpush.msrb.mxu0 %v935_v44  ;;  %v945_v44 = vld [vmem:[#allocation6 + $0x360] sm:$0xff] }
  0xd6   : > { %969 = vmatpush.msra.mxu2 %v925_v46  ;;  %992 = vmatpush.msrb.mxu3 %v926_v47  ;;  %v947_v46 = vld [vmem:[#allocation6 + $0x370] sm:$0xff]  ;;  %v948_v47 = vld [vmem:[#allocation6 + $0x378] sm:$0xff] }
  0xd7   : > { %1015 = vmatpush.msrb.mxu0 %v927_v48  ;;  %v937_v48 = vld [vmem:[#allocation6 + $0x320] sm:$0xff] }
  0xd8   : > { %970 = vmatpush.msra.mxu2 %v917_v50  ;;  %993 = vmatpush.msrb.mxu3 %v918_v51  ;;  %v939_v50 = vld [vmem:[#allocation6 + $0x330] sm:$0xff]  ;;  %v940_v51 = vld [vmem:[#allocation6 + $0x338] sm:$0xff] }
  0xd9   : > { %1016 = vmatpush.msrb.mxu0 %v919_v52  ;;  %v929_v52 = vld [vmem:[#allocation6 + $0x2e0] sm:$0xff] }
  0xda   : > { %2288 = vmatmul.msk.f32.vlgmr.msrb.gmra.mxu1 %vm550_vm0, %v580_v26  ;;  %2290 = vmatmul.msk.f32.vlgmr.msrb.gmra.mxu2 %vm550_vm0, %v580_v26 }
  0xdb   : > { %2292 = vmatmul.msk.f32.vlgmr.msra.gmra.mxu3 %vm550_vm0, %v580_v26  ;;  %2294 = vmatmul.msk.f32.vlgmr.msra.gmra.mxu0 %vm550_vm0, %v580_v26  ;;  %v845_v26 = vld [vmem:[#allocation6 + $0x40] sm:$0xff] }
  0xdc   : > { %1034 = vmatpush.msrb.mxu1 %v960_v41  ;;  %971 = vmatpush.msra.mxu2 %v909_v54  ;;  %v954_v41 = vld [vmem:[#allocation6 + $0x3a8] sm:$0xff]  ;;  %v931_v54 = vld [vmem:[#allocation6 + $0x2f0] sm:$0xff] }
  0xdd   : > { %994 = vmatpush.msrb.mxu3 %v910_v55  ;;  %1017 = vmatpush.msrb.mxu0 %v911_v56  ;;  %v932_v55 = vld [vmem:[#allocation6 + $0x2f8] sm:$0xff]  ;;  %v921_v56 = vld [vmem:[#allocation6 + $0x2a0] sm:$0xff] }
  0xde   : > { %1035 = vmatpush.msrb.mxu1 %v952_v45  ;;  %972 = vmatpush.msra.mxu2 %v901_v62  ;;  %v946_v45 = vld [vmem:[#allocation6 + $0x368] sm:$0xff]  ;;  %v915_v62 = vld [vmem:[#allocation6 + $0x270] sm:$0xff] }
  0xdf   : > { %995 = vmatpush.msrb.mxu3 %v902_v63  ;;  %1018 = vmatpush.msrb.mxu0 %v903_v0  ;;  %v916_v63 = vld [vmem:[#allocation6 + $0x278] sm:$0xff] }
  0xe0   : > { %1036 = vmatpush.msrb.mxu1 %v944_v49  ;;  %973 = vmatpush.msra.mxu2 %v893_v2  ;;  %v938_v49 = vld [vmem:[#allocation6 + $0x328] sm:$0xff] }
  0xe1   : > { %996 = vmatpush.msrb.mxu3 %v894_v3  ;;  %1019 = vmatpush.msrb.mxu0 %v895_v4  ;;  %v906_v2 = vld [vmem:[#allocation6 + $0x228] sm:$0xff]  ;;  %v907_v3 = vld [vmem:[#allocation6 + $0x230] sm:$0xff]  ;;  %v908_v4 = vld [vmem:[#allocation6 + $0x238] sm:$0xff] }
  0xe2   : > { %2289 = vmatmul.msk.f32.gmra.mxu1 %vm550_vm0, %v581_v31  ;;  %2291 = vmatmul.msk.f32.gmra.mxu2 %vm550_vm0, %v581_v31 }
  0xe3   : > { %2293 = vmatmul.msk.f32.gmra.mxu3 %vm550_vm0, %v581_v31  ;;  %2295 = vmatmul.msk.f32.gmra.mxu0 %vm550_vm0, %v581_v31  ;;  %v848_v31 = vld [vmem:[#allocation6 + $0x58] sm:$0xff] }
  0xe4   : > { %1037 = vmatpush.msrb.mxu1 %v936_v53  ;;  %974 = vmatpush.msra.mxu2 %v885_v6  ;;  %v930_v53 = vld [vmem:[#allocation6 + $0x2e8] sm:$0xff] }
  0xe5   : > { %997 = vmatpush.msrb.mxu3 %v886_v7  ;;  %1020 = vmatpush.msrb.mxu0 %v887_v8  ;;  %v898_v6 = vld [vmem:[#allocation6 + $0x1e8] sm:$0xff]  ;;  %v899_v7 = vld [vmem:[#allocation6 + $0x1f0] sm:$0xff]  ;;  %v900_v8 = vld [vmem:[#allocation6 + $0x1f8] sm:$0xff] }
  0xe6   : > { %1038 = vmatpush.msrb.mxu1 %v928_v57  ;;  %975 = vmatpush.msra.mxu2 %v877_v10  ;;  %v922_v57 = vld [vmem:[#allocation6 + $0x2a8] sm:$0xff] }
  0xe7   : > { %998 = vmatpush.msrb.mxu3 %v878_v11  ;;  %1021 = vmatpush.msrb.mxu0 %v879_v12  ;;  %v890_v10 = vld [vmem:[#allocation6 + $0x1a8] sm:$0xff]  ;;  %v891_v11 = vld [vmem:[#allocation6 + $0x1b0] sm:$0xff]  ;;  %v892_v12 = vld [vmem:[#allocation6 + $0x1b8] sm:$0xff] }
  0xe8   : > { %1039 = vmatpush.msrb.mxu1 %v920_v58  ;;  %976 = vmatpush.msra.mxu2 %v869_v14  ;;  %v923_v58 = vld [vmem:[#allocation6 + $0x2b0] sm:$0xff]  ;;  %v882_v14 = vld [vmem:[#allocation6 + $0x168] sm:$0xff] }
  0xe9   : > { %999 = vmatpush.msrb.mxu3 %v870_v15  ;;  %1022 = vmatpush.msrb.mxu0 %v871_v16  ;;  %v883_v15 = vld [vmem:[#allocation6 + $0x170] sm:$0xff]  ;;  %v884_v16 = vld [vmem:[#allocation6 + $0x178] sm:$0xff] }
  0xea   : > { %2296 = vmatmul.msk.f32.vlgmr.msra.gmra.mxu1 %vm550_vm0, %v806_v59  ;;  %977 = vmatpush.msra.mxu2 %v861_v18  ;;  %v924_v59 = vld [vmem:[#allocation6 + $0x2b8] sm:$0xff]  ;;  %v873_v18 = vld [vmem:[#allocation6 + $0x120] sm:$0xff] }
  0xeb   : > { %1040 = vmatpush.msrb.mxu1 %v912_v60  ;;  %1000 = vmatpush.msrb.mxu3 %v862_v19  ;;  %v913_v60 = vld [vmem:[#allocation6 + $0x260] sm:$0xff]  ;;  %v874_v19 = vld [vmem:[#allocation6 + $0x128] sm:$0xff] }
  0xec   : > { %1023 = vmatpush.msrb.mxu0 %v863_v20  ;;  %978 = vmatpush.msra.mxu2 %v853_v22  ;;  %v875_v20 = vld [vmem:[#allocation6 + $0x130] sm:$0xff]  ;;  %v865_v22 = vld [vmem:[#allocation6 + $0xe0] sm:$0xff] }
  0xed   : > { %1041 = vmatpush.msrb.mxu1 %v904_v1  ;;  %1001 = vmatpush.msrb.mxu3 %v854_v23  ;;  %v905_v1 = vld [vmem:[#allocation6 + $0x220] sm:$0xff]  ;;  %v866_v23 = vld [vmem:[#allocation6 + $0xe8] sm:$0xff] }
  0xee   : > { %1024 = vmatpush.msrb.mxu0 %v855_v24  ;;  %979 = vmatpush.msra.mxu2 %v845_v26  ;;  %v867_v24 = vld [vmem:[#allocation6 + $0xf0] sm:$0xff]  ;;  %v857_v26 = vld [vmem:[#allocation6 + $0xa0] sm:$0xff] }
  0xef   : > { %1042 = vmatpush.msrb.mxu1 %v896_v5  ;;  %1002 = vmatpush.msrb.mxu3 %v846_v28  ;;  %v897_v5 = vld [vmem:[#allocation6 + $0x1e0] sm:$0xff]  ;;  %v858_v28 = vld [vmem:[#allocation6 + $0xa8] sm:$0xff] }
  0xf0   : > { %1025 = vmatpush.msrb.mxu0 %v847_v30  ;;  %980 = vmatpush.msra.mxu2 %v837_v32  ;;  %v859_v30 = vld [vmem:[#allocation6 + $0xb0] sm:$0xff]  ;;  %v849_v32 = vld [vmem:[#allocation6 + $0x60] sm:$0xff] }
  0xf1   : > { %1043 = vmatpush.msrb.mxu1 %v888_v9  ;;  %1003 = vmatpush.msrb.mxu3 %v838_v33  ;;  %v889_v9 = vld [vmem:[#allocation6 + $0x1a0] sm:$0xff]  ;;  %v850_v33 = vld [vmem:[#allocation6 + $0x68] sm:$0xff] }
  0xf2   : > { %2297 = vmatmul.msk.f32.gmra.mxu1 %vm550_vm0, %v807_v61  ;;  %1026 = vmatpush.msrb.mxu0 %v839_v34  ;;  %v914_v61 = vld [vmem:[#allocation6 + $0x268] sm:$0xff]  ;;  %v851_v34 = vld [vmem:[#allocation6 + $0x70] sm:$0xff] }
  0xf3   : > { %1044 = vmatpush.msrb.mxu1 %v880_v13  ;;  %1057 = vmatpush.msrb.mxu2 %v961_v36  ;;  %v881_v13 = vld [vmem:[#allocation6 + $0x160] sm:$0xff] }
  0xf4   : > { %1080 = vmatpush.msra.mxu3 %v962_v37  ;;  %1103 = vmatpush.msra.mxu0 %v963_v38  ;;  %v841_v36 = vld [vmem:[#allocation6 + $0x20] sm:$0xff]  ;;  %v842_v37 = vld [vmem:[#allocation6 + $0x28] sm:$0xff] }
  0xf5   : > { %1045 = vmatpush.msrb.mxu1 %v872_v17  ;;  %1058 = vmatpush.msrb.mxu2 %v953_v40  ;;  %v844_v40 = vld [vmem:[#allocation6 + $0x38] sm:$0xff] }
  0xf6   : > { %1081 = vmatpush.msra.mxu3 %v954_v41  ;;  %1104 = vmatpush.msra.mxu0 %v955_v42 }
  0xf7   : > { %1046 = vmatpush.msrb.mxu1 %v864_v21  ;;  %1059 = vmatpush.msrb.mxu2 %v945_v44  ;;  %v876_v21 = vld [vmem:[#allocation6 + $0x138] sm:$0xff] }
  0xf8   : > { %1082 = vmatpush.msra.mxu3 %v946_v45  ;;  %1105 = vmatpush.msra.mxu0 %v947_v46  ;;  %v1228_v44 = vld [vmem:[#allocation8 + $0x1f8] sm:$0xff] }
  0xf9   : > { %1047 = vmatpush.msrb.mxu1 %v856_v25  ;;  %1060 = vmatpush.msrb.mxu2 %v937_v48  ;;  %v868_v25 = vld [vmem:[#allocation6 + $0xf8] sm:$0xff]  ;;  %v1227_v48 = vld [vmem:[#allocation8 + $0x1f0] sm:$0xff] }
  0xfa   : > { %1083 = vmatpush.msra.mxu3 %v938_v49  ;;  %1106 = vmatpush.msra.mxu0 %v939_v50  ;;  %v1180_v45 = vld [vmem:[#allocation8 + $0x78] sm:$0xff]  ;;  %v1179_v49 = vld [vmem:[#allocation8 + $0x70] sm:$0xff] }
  0xfb   : > { %1048 = vmatpush.msrb.mxu1 %v848_v31  ;;  %1061 = vmatpush.msrb.mxu2 %v929_v52  ;;  %v860_v31 = vld [vmem:[#allocation6 + $0xb8] sm:$0xff]  ;;  %v1195_v50 = vld [vmem:[#allocation8 + $0xf0] sm:$0xff]  ;;  %v1226_v52 = vld [vmem:[#allocation8 + $0x1e8] sm:$0xff] }
  0xfc   : > { %1084 = vmatpush.msra.mxu3 %v930_v53  ;;  %1107 = vmatpush.msra.mxu0 %v931_v54  ;;  %v1196_v46 = vld [vmem:[#allocation8 + $0xf8] sm:$0xff]  ;;  %v1178_v53 = vld [vmem:[#allocation8 + $0x68] sm:$0xff] }
  0xfd   : > { %1049 = vmatpush.msrb.mxu1 %v840_v35  ;;  %1062 = vmatpush.msrb.mxu2 %v921_v56  ;;  %v852_v35 = vld [vmem:[#allocation6 + $0x78] sm:$0xff]  ;;  %v1194_v54 = vld [vmem:[#allocation8 + $0xe8] sm:$0xff]  ;;  %v1209_v56 = vld [vmem:[#allocation8 + $0x160] sm:$0xff] }
  0xfe   : > { %1085 = vmatpush.msra.mxu3 %v922_v57  ;;  %1108 = vmatpush.msra.mxu0 %v923_v58  ;;  %v1225_v57 = vld [vmem:[#allocation8 + $0x1e0] sm:$0xff] }
  0xff   : > { %1126 = vmatpush.msra.mxu1 %v964_v39  ;;  %1063 = vmatpush.msrb.mxu2 %v913_v60  ;;  %v843_v39 = vld [vmem:[#allocation6 + $0x30] sm:$0xff]  ;;  %v1177_v58 = vld [vmem:[#allocation8 + $0x60] sm:$0xff]  ;;  %v1208_v60 = vld [vmem:[#allocation8 + $0x158] sm:$0xff] }
 0x100   : > { %1086 = vmatpush.msra.mxu3 %v914_v61  ;;  %1109 = vmatpush.msra.mxu0 %v915_v62  ;;  %v1224_v61 = vld [vmem:[#allocation8 + $0x1d8] sm:$0xff] }
 0x101   : > { %1127 = vmatpush.msra.mxu1 %v956_v43  ;;  %1064 = vmatpush.msrb.mxu2 %v905_v1  ;;  %v1212_v43 = vld [vmem:[#allocation8 + $0x178] sm:$0xff]  ;;  %v1207_v1 = vld [vmem:[#allocation8 + $0x150] sm:$0xff] }
 0x102   : > { %1087 = vmatpush.msra.mxu3 %v906_v2  ;;  %1110 = vmatpush.msra.mxu0 %v907_v3  ;;  %v1176_v62 = vld [vmem:[#allocation8 + $0x58] sm:$0xff]  ;;  %v1223_v2 = vld [vmem:[#allocation8 + $0x1d0] sm:$0xff] }
 0x103   : > { %1128 = vmatpush.msra.mxu1 %v948_v47  ;;  %1065 = vmatpush.msrb.mxu2 %v897_v5  ;;  %v1211_v47 = vld [vmem:[#allocation8 + $0x170] sm:$0xff]  ;;  %v1206_v5 = vld [vmem:[#allocation8 + $0x148] sm:$0xff] }
 0x104   : > { %1088 = vmatpush.msra.mxu3 %v898_v6  ;;  %1111 = vmatpush.msra.mxu0 %v899_v7  ;;  %v1175_v3 = vld [vmem:[#allocation8 + $0x50] sm:$0xff]  ;;  %v1222_v6 = vld [vmem:[#allocation8 + $0x1c8] sm:$0xff] }
 0x105   : > { %1129 = vmatpush.msra.mxu1 %v940_v51  ;;  %1066 = vmatpush.msrb.mxu2 %v889_v9  ;;  %v1210_v51 = vld [vmem:[#allocation8 + $0x168] sm:$0xff]  ;;  %v1205_v9 = vld [vmem:[#allocation8 + $0x140] sm:$0xff] }
 0x106   : > { %1089 = vmatpush.msra.mxu3 %v890_v10  ;;  %1112 = vmatpush.msra.mxu0 %v891_v11  ;;  %v1174_v7 = vld [vmem:[#allocation8 + $0x48] sm:$0xff]  ;;  %v1221_v10 = vld [vmem:[#allocation8 + $0x1c0] sm:$0xff] }
 0x107   : > { %1130 = vmatpush.msra.mxu1 %v932_v55  ;;  %1067 = vmatpush.msrb.mxu2 %v881_v13  ;;  %v1173_v11 = vld [vmem:[#allocation8 + $0x40] sm:$0xff]  ;;  %v1204_v13 = vld [vmem:[#allocation8 + $0x138] sm:$0xff] }
 0x108   : > { %1090 = vmatpush.msra.mxu3 %v882_v14  ;;  %1113 = vmatpush.msra.mxu0 %v883_v15  ;;  %v1220_v14 = vld [vmem:[#allocation8 + $0x1b8] sm:$0xff] }
 0x109   : > { %1131 = vmatpush.msra.mxu1 %v924_v59  ;;  %1068 = vmatpush.msrb.mxu2 %v873_v18  ;;  %v1193_v59 = vld [vmem:[#allocation8 + $0xe0] sm:$0xff]  ;;  %v1172_v15 = vld [vmem:[#allocation8 + $0x38] sm:$0xff]  ;;  %v1203_v18 = vld [vmem:[#allocation8 + $0x130] sm:$0xff] }
 0x10a   : > { %1091 = vmatpush.msra.mxu3 %v874_v19  ;;  %1114 = vmatpush.msra.mxu0 %v875_v20  ;;  %v1219_v19 = vld [vmem:[#allocation8 + $0x1b0] sm:$0xff] }
 0x10b   : > { %1132 = vmatpush.msra.mxu1 %v916_v63  ;;  %1069 = vmatpush.msrb.mxu2 %v865_v22  ;;  %v1192_v63 = vld [vmem:[#allocation8 + $0xd8] sm:$0xff]  ;;  %v1171_v20 = vld [vmem:[#allocation8 + $0x30] sm:$0xff]  ;;  %v1202_v22 = vld [vmem:[#allocation8 + $0x128] sm:$0xff] }
 0x10c   : > { %1092 = vmatpush.msra.mxu3 %v866_v23  ;;  %1115 = vmatpush.msra.mxu0 %v867_v24  ;;  %v1218_v23 = vld [vmem:[#allocation8 + $0x1a8] sm:$0xff] }
 0x10d   : > { %1133 = vmatpush.msra.mxu1 %v908_v4  ;;  %1070 = vmatpush.msrb.mxu2 %v857_v26  ;;  %v1191_v4 = vld [vmem:[#allocation8 + $0xd0] sm:$0xff]  ;;  %v1170_v24 = vld [vmem:[#allocation8 + $0x28] sm:$0xff]  ;;  %v1201_v26 = vld [vmem:[#allocation8 + $0x120] sm:$0xff] }
 0x10e   : > { %1093 = vmatpush.msra.mxu3 %v858_v28  ;;  %1116 = vmatpush.msra.mxu0 %v859_v30  ;;  %v1217_v28 = vld [vmem:[#allocation8 + $0x1a0] sm:$0xff] }
 0x10f   : > { %1134 = vmatpush.msra.mxu1 %v900_v8  ;;  %1071 = vmatpush.msrb.mxu2 %v849_v32  ;;  %v1190_v8 = vld [vmem:[#allocation8 + $0xc8] sm:$0xff]  ;;  %v1169_v30 = vld [vmem:[#allocation8 + $0x20] sm:$0xff]  ;;  %v1200_v32 = vld [vmem:[#allocation8 + $0x118] sm:$0xff] }
 0x110   : > { %1094 = vmatpush.msra.mxu3 %v850_v33  ;;  %1117 = vmatpush.msra.mxu0 %v851_v34  ;;  %v1216_v33 = vld [vmem:[#allocation8 + $0x198] sm:$0xff] }
 0x111   : > { %1135 = vmatpush.msra.mxu1 %v892_v12  ;;  %1072 = vmatpush.msrb.mxu2 %v841_v36  ;;  %v1189_v12 = vld [vmem:[#allocation8 + $0xc0] sm:$0xff]  ;;  %v1168_v34 = vld [vmem:[#allocation8 + $0x18] sm:$0xff]  ;;  %v1199_v36 = vld [vmem:[#allocation8 + $0x110] sm:$0xff] }
 0x112   : > { %1095 = vmatpush.msra.mxu3 %v842_v37  ;;  %1118 = vmatpush.msra.mxu0 %v843_v39  ;;  %v1215_v37 = vld [vmem:[#allocation8 + $0x190] sm:$0xff] }
 0x113   : > { %1136 = vmatpush.msra.mxu1 %v884_v16  ;;  %v1188_v16 = vld [vmem:[#allocation8 + $0xb8] sm:$0xff]  ;;  %v1167_v39 = vld [vmem:[#allocation8 + $0x10] sm:$0xff] }
 0x115   : > { %1137 = vmatpush.msra.mxu1 %v876_v21  ;;  %v1187_v21 = vld [vmem:[#allocation8 + $0xb0] sm:$0xff] }
 0x117   : > { %1138 = vmatpush.msra.mxu1 %v868_v25  ;;  %v1186_v25 = vld [vmem:[#allocation8 + $0xa8] sm:$0xff] }
 0x119   : > { %1139 = vmatpush.msra.mxu1 %v860_v31  ;;  %v1185_v31 = vld [vmem:[#allocation8 + $0xa0] sm:$0xff] }
 0x11b   : > { %1140 = vmatpush.msra.mxu1 %v852_v35  ;;  %v1184_v35 = vld [vmem:[#allocation8 + $0x98] sm:$0xff] }
 0x11d   : > { %1141 = vmatpush.msra.mxu1 %v844_v40  ;;  %v1183_v40 = vld [vmem:[#allocation8 + $0x90] sm:$0xff] }
 0x147   : > { %v2860_v0 = vpop.f32.mrf.mxu1 }
 0x14f   : > { %v2862_v17 = vpop.f32.mrf.mxu1 }
 0x157   : > { %v2864_v38 = vpop.f32.mrf.mxu1 }
 0x15f   : > { %v2866_v41 = vpop.f32.mrf.mxu1 }
 0x167   : > { %v2868_v42 = vpop.f32.mrf.mxu1 }
 0x168   : > { %981 = vmatmul.f32.vlgmr.msra.gmra.mxu2 %v2868_v42  ;;  %1004 = vmatmul.f32.vlgmr.msrb.gmra.mxu3 %v2868_v42 }
 0x169   : > { %1027 = vmatmul.f32.vlgmr.msrb.gmra.mxu0 %v2868_v42  ;;  %1050 = vmatmul.f32.vlgmr.msrb.gmra.mxu1 %v2868_v42 }
 0x16a   : > { %1339 = vmatpush.msrb.mxu0 %v1212_v43  ;;  %1362 = vmatpush.msrb.mxu1 %v1228_v44  ;;  %v1214_v43 = vld [vmem:[#allocation8 + $0x188] sm:$0xff] }
 0x16b   : > { %1293 = vmatpush.msra.mxu2 %v1180_v45  ;;  %1316 = vmatpush.msrb.mxu3 %v1196_v46  ;;  %v1166_v44 = vld [vmem:[#allocation8 + $0x8] sm:$0xff]  ;;  %v1197_v46 = vld [vmem:[#allocation8 + $0x100] sm:$0xff] }
 0x16c   : > { %1340 = vmatpush.msrb.mxu0 %v1211_v47  ;;  %1363 = vmatpush.msrb.mxu1 %v1227_v48  ;;  %v1182_v45 = vld [vmem:[#allocation8 + $0x88] sm:$0xff]  ;;  %v1213_v47 = vld [vmem:[#allocation8 + $0x180] sm:$0xff]  ;;  %v1276_v48 = vld [vmem:[#allocation8 + $0x378] sm:$0xff] }
 0x16d   : > { %1294 = vmatpush.msra.mxu2 %v1179_v49  ;;  %1317 = vmatpush.msrb.mxu3 %v1195_v50  ;;  %v1292_v49 = vld [vmem:[#allocation8 + $0x3f8] sm:$0xff]  ;;  %v1165_v50 = vld [vmem:[#allocation8] sm:$0xff] }
 0x16e   : > { %1341 = vmatpush.msrb.mxu0 %v1210_v51  ;;  %1364 = vmatpush.msrb.mxu1 %v1226_v52  ;;  %v1181_v51 = vld [vmem:[#allocation8 + $0x80] sm:$0xff]  ;;  %v1275_v52 = vld [vmem:[#allocation8 + $0x370] sm:$0xff] }
 0x16f   : > { %v2874_v55 = vpop.f32.mrf.mxu1  ;;  %1295 = vmatpush.msra.mxu2 %v1178_v53  ;;  %1318 = vmatpush.msrb.mxu3 %v1194_v54  ;;  %v1291_v53 = vld [vmem:[#allocation8 + $0x3f0] sm:$0xff]  ;;  %v1244_v54 = vld [vmem:[#allocation8 + $0x278] sm:$0xff] }
 0x170   : > { %984 = vmatmul.f32.gmra.mxu2 %v2874_v55  ;;  %1007 = vmatmul.f32.gmra.mxu3 %v2874_v55 }
 0x171   : > { %1030 = vmatmul.f32.gmra.mxu0 %v2874_v55  ;;  %1053 = vmatmul.f32.gmra.mxu1 %v2874_v55 }
 0x172   : > { %1342 = vmatpush.msrb.mxu0 %v1209_v56  ;;  %1365 = vmatpush.msrb.mxu1 %v1225_v57  ;;  %v1274_v56 = vld [vmem:[#allocation8 + $0x368] sm:$0xff] }
 0x173   : > { %1296 = vmatpush.msra.mxu2 %v1177_v58  ;;  %1319 = vmatpush.msrb.mxu3 %v1193_v59  ;;  %v1290_v57 = vld [vmem:[#allocation8 + $0x3e8] sm:$0xff]  ;;  %v1243_v58 = vld [vmem:[#allocation8 + $0x270] sm:$0xff] }
 0x174   : > { %1343 = vmatpush.msrb.mxu0 %v1208_v60  ;;  %1366 = vmatpush.msrb.mxu1 %v1224_v61  ;;  %v1259_v59 = vld [vmem:[#allocation8 + $0x2f0] sm:$0xff]  ;;  %v1273_v60 = vld [vmem:[#allocation8 + $0x360] sm:$0xff] }
 0x175   : > { %1297 = vmatpush.msra.mxu2 %v1176_v62  ;;  %1320 = vmatpush.msrb.mxu3 %v1192_v63  ;;  %v1289_v61 = vld [vmem:[#allocation8 + $0x3e0] sm:$0xff]  ;;  %v1242_v62 = vld [vmem:[#allocation8 + $0x268] sm:$0xff] }
 0x176   : > { %1344 = vmatpush.msrb.mxu0 %v1207_v1  ;;  %1367 = vmatpush.msrb.mxu1 %v1223_v2  ;;  %v1258_v63 = vld [vmem:[#allocation8 + $0x2e8] sm:$0xff]  ;;  %v1272_v1 = vld [vmem:[#allocation8 + $0x358] sm:$0xff] }
 0x177   : > { %1298 = vmatpush.msra.mxu2 %v1175_v3  ;;  %1321 = vmatpush.msrb.mxu3 %v1191_v4  ;;  %v1288_v2 = vld [vmem:[#allocation8 + $0x3d8] sm:$0xff]  ;;  %v1271_v3 = vld [vmem:[#allocation8 + $0x350] sm:$0xff] }
 0x178   : > { %1073 = vmatmul.f32.vlgmr.msrb.gmra.mxu2 %v2868_v42  ;;  %1096 = vmatmul.f32.vlgmr.msra.gmra.mxu3 %v2868_v42  ;;  %v1287_v4 = vld [vmem:[#allocation8 + $0x3d0] sm:$0xff] }
 0x179   : > { %1119 = vmatmul.f32.vlgmr.msra.gmra.mxu0 %v2868_v42  ;;  %1142 = vmatmul.f32.vlgmr.msra.gmra.mxu1 %v2868_v42  ;;  %v1198_v42 = vld [vmem:[#allocation8 + $0x108] sm:$0xff] }
 0x17a   : > { %1345 = vmatpush.msrb.mxu0 %v1206_v5  ;;  %1368 = vmatpush.msrb.mxu1 %v1222_v6  ;;  %v2888_v5 = vpop.f32.mrf.mxu0  ;;  %v2890_v6 = vpop.f32.mrf.mxu2 }
 0x17b   : > { %1299 = vmatpush.msra.mxu2 %v1174_v7  ;;  %1322 = vmatpush.msrb.mxu3 %v1190_v8  ;;  %v2892_v7 = vpop.f32.mrf.mxu3  ;;  %v1241_v8 = vld [vmem:[#allocation8 + $0x260] sm:$0xff] }
 0x17c   : > { %1346 = vmatpush.msrb.mxu0 %v1205_v9  ;;  %1369 = vmatpush.msrb.mxu1 %v1221_v10  ;;  %v1257_v9 = vld [vmem:[#allocation8 + $0x2e0] sm:$0xff]  ;;  %v1270_v10 = vld [vmem:[#allocation8 + $0x348] sm:$0xff] }
 0x17d   : > { %1300 = vmatpush.msra.mxu2 %v1173_v11  ;;  %1323 = vmatpush.msrb.mxu3 %v1189_v12  ;;  %v1286_v11 = vld [vmem:[#allocation8 + $0x3c8] sm:$0xff]  ;;  %v1240_v12 = vld [vmem:[#allocation8 + $0x258] sm:$0xff] }
 0x17e   : > { %1347 = vmatpush.msrb.mxu0 %v1204_v13  ;;  %1370 = vmatpush.msrb.mxu1 %v1220_v14  ;;  %v1256_v13 = vld [vmem:[#allocation8 + $0x2d8] sm:$0xff]  ;;  %v1269_v14 = vld [vmem:[#allocation8 + $0x340] sm:$0xff] }
 0x17f   : > { %1301 = vmatpush.msra.mxu2 %v1172_v15  ;;  %1324 = vmatpush.msrb.mxu3 %v1188_v16  ;;  %v1285_v15 = vld [vmem:[#allocation8 + $0x3c0] sm:$0xff]  ;;  %v1239_v16 = vld [vmem:[#allocation8 + $0x250] sm:$0xff] }
 0x180   : > { %1076 = vmatmul.f32.gmra.mxu2 %v2874_v55  ;;  %1099 = vmatmul.f32.gmra.mxu3 %v2874_v55 }
 0x181   : > { %1122 = vmatmul.f32.gmra.mxu0 %v2874_v55  ;;  %1145 = vmatmul.f32.gmra.mxu1 %v2874_v55  ;;  %v1260_v55 = vld [vmem:[#allocation8 + $0x2f8] sm:$0xff] }
 0x182   : > { %1348 = vmatpush.msrb.mxu0 %v1203_v18  ;;  %1371 = vmatpush.msrb.mxu1 %v1219_v19  ;;  %v1255_v18 = vld [vmem:[#allocation8 + $0x2d0] sm:$0xff]  ;;  %v1268_v19 = vld [vmem:[#allocation8 + $0x338] sm:$0xff] }
 0x183   : > { %1302 = vmatpush.msra.mxu2 %v1171_v20  ;;  %1325 = vmatpush.msrb.mxu3 %v1187_v21  ;;  %v2894_v20 = vpop.f32.mrf.mxu0  ;;  %v1284_v21 = vld [vmem:[#allocation8 + $0x3b8] sm:$0xff] }
 0x184   : > { %1349 = vmatpush.msrb.mxu0 %v1202_v22  ;;  %1372 = vmatpush.msrb.mxu1 %v1218_v23  ;;  %v1238_v22 = vld [vmem:[#allocation8 + $0x248] sm:$0xff] }
 0x185   : > { %1303 = vmatpush.msra.mxu2 %v1170_v24  ;;  %1326 = vmatpush.msrb.mxu3 %v1186_v25  ;;  %v1254_v23 = vld [vmem:[#allocation8 + $0x2c8] sm:$0xff]  ;;  %v1267_v24 = vld [vmem:[#allocation8 + $0x330] sm:$0xff] }
 0x186   : > { %1350 = vmatpush.msrb.mxu0 %v1201_v26  ;;  %1373 = vmatpush.msrb.mxu1 %v1217_v28  ;;  %v1283_v25 = vld [vmem:[#allocation8 + $0x3b0] sm:$0xff]  ;;  %v1237_v26 = vld [vmem:[#allocation8 + $0x240] sm:$0xff] }
 0x187   : > { %1304 = vmatpush.msra.mxu2 %v1169_v30  ;;  %1327 = vmatpush.msrb.mxu3 %v1185_v31  ;;  %v1253_v28 = vld [vmem:[#allocation8 + $0x2c0] sm:$0xff]  ;;  %v1266_v30 = vld [vmem:[#allocation8 + $0x328] sm:$0xff] }
 0x188   : > { %1351 = vmatpush.msrb.mxu0 %v1200_v32  ;;  %1374 = vmatpush.msrb.mxu1 %v1216_v33  ;;  %v1282_v31 = vld [vmem:[#allocation8 + $0x3a8] sm:$0xff]  ;;  %v2896_v32 = vpop.f32.mrf.mxu2  ;;  %v2898_v33 = vpop.f32.mrf.mxu3 }
 0x189   : > { %1305 = vmatpush.msra.mxu2 %v1168_v34  ;;  %1328 = vmatpush.msrb.mxu3 %v1184_v35  ;;  %v1236_v34 = vld [vmem:[#allocation8 + $0x238] sm:$0xff] }
 0x18a   : > { %1352 = vmatpush.msrb.mxu0 %v1199_v36  ;;  %1375 = vmatpush.msrb.mxu1 %v1215_v37  ;;  %v1252_v35 = vld [vmem:[#allocation8 + $0x2b8] sm:$0xff]  ;;  %v1265_v36 = vld [vmem:[#allocation8 + $0x320] sm:$0xff] }
 0x18b   : > { %1306 = vmatpush.msra.mxu2 %v1167_v39  ;;  %1329 = vmatpush.msrb.mxu3 %v1183_v40  ;;  %v1281_v37 = vld [vmem:[#allocation8 + $0x3a0] sm:$0xff]  ;;  %v1235_v39 = vld [vmem:[#allocation8 + $0x230] sm:$0xff] }
 0x18c   : > { %1353 = vmatpush.msrb.mxu0 %v1198_v42  ;;  %1376 = vmatpush.msrb.mxu1 %v1214_v43  ;;  %v1251_v40 = vld [vmem:[#allocation8 + $0x2b0] sm:$0xff]  ;;  %v1264_v42 = vld [vmem:[#allocation8 + $0x318] sm:$0xff] }
 0x18d   : > { %1307 = vmatpush.msra.mxu2 %v1166_v44  ;;  %1330 = vmatpush.msrb.mxu3 %v1182_v45  ;;  %v1280_v43 = vld [vmem:[#allocation8 + $0x398] sm:$0xff]  ;;  %v1234_v44 = vld [vmem:[#allocation8 + $0x228] sm:$0xff] }
 0x18e   : > { %1354 = vmatpush.msrb.mxu0 %v1197_v46  ;;  %1377 = vmatpush.msrb.mxu1 %v1213_v47  ;;  %v1250_v45 = vld [vmem:[#allocation8 + $0x2a8] sm:$0xff]  ;;  %v1263_v46 = vld [vmem:[#allocation8 + $0x310] sm:$0xff]  ;;  %v2900_v47 = vpop.f32.mrf.mxu0 }
 0x18f   : > { %1308 = vmatpush.msra.mxu2 %v1165_v50  ;;  %1331 = vmatpush.msrb.mxu3 %v1181_v51  ;;  %v1249_v50 = vld [vmem:[#allocation8 + $0x2a0] sm:$0xff]  ;;  %v1262_v51 = vld [vmem:[#allocation8 + $0x308] sm:$0xff] }
 0x190   : > { %1431 = vmatpush.msra.mxu0 %v1276_v48  ;;  %1454 = vmatpush.msra.mxu1 %v1292_v49  ;;  %v1279_v48 = vld [vmem:[#allocation8 + $0x390] sm:$0xff]  ;;  %v1233_v49 = vld [vmem:[#allocation8 + $0x220] sm:$0xff] }
 0x191   : > { %1385 = vmatpush.msrb.mxu2 %v1244_v54  ;;  %1408 = vmatpush.msra.mxu3 %v1260_v55  ;;  %v1248_v54 = vld [vmem:[#allocation8 + $0x298] sm:$0xff]  ;;  %v1261_v55 = vld [vmem:[#allocation8 + $0x300] sm:$0xff] }
 0x192   : > { %1432 = vmatpush.msra.mxu0 %v1275_v52  ;;  %1455 = vmatpush.msra.mxu1 %v1291_v53  ;;  %v1278_v52 = vld [vmem:[#allocation8 + $0x388] sm:$0xff]  ;;  %v1232_v53 = vld [vmem:[#allocation8 + $0x218] sm:$0xff] }
 0x193   : > { %1386 = vmatpush.msrb.mxu2 %v1243_v58  ;;  %1409 = vmatpush.msra.mxu3 %v1259_v59  ;;  %v2903_v58 = vpop.f32.mrf.mxu2  ;;  %v777_v59 = vpop.f32.mrf.mxu3 }
 0x194   : > { %1433 = vmatpush.msra.mxu0 %v1274_v56  ;;  %1456 = vmatpush.msra.mxu1 %v1290_v57  ;;  %v1277_v56 = vld [vmem:[#allocation8 + $0x380] sm:$0xff]  ;;  %v1479_v57 = vld [vmem:[%s2814_s28] sm:$0xff] }
 0x195   : > { %1387 = vmatpush.msrb.mxu2 %v1242_v62  ;;  %1410 = vmatpush.msra.mxu3 %v1258_v63  ;;  %v1230_v62 = vld [vmem:[#allocation8 + $0x208] sm:$0xff] }
 0x196   : > { %1434 = vmatpush.msra.mxu0 %v1273_v60  ;;  %1457 = vmatpush.msra.mxu1 %v1289_v61  ;;  %v1231_v60 = vld [vmem:[#allocation8 + $0x210] sm:$0xff]  ;;  %v1246_v63 = vld [vmem:[#allocation8 + $0x288] sm:$0xff] }
 0x197   : > { %1388 = vmatpush.msrb.mxu2 %v1241_v8  ;;  %1411 = vmatpush.msra.mxu3 %v1257_v9  ;;  %v1247_v61 = vld [vmem:[#allocation8 + $0x290] sm:$0xff]  ;;  %v1480_v8 = vld [vmem:[%s2814_s28 + $0x8] sm:$0xff] }
 0x198   : > { %1435 = vmatpush.msra.mxu0 %v1272_v1  ;;  %1458 = vmatpush.msra.mxu1 %v1288_v2  ;;  %v1229_v1 = vld [vmem:[#allocation8 + $0x200] sm:$0xff] }
 0x199   : > { %1389 = vmatpush.msrb.mxu2 %v1240_v12  ;;  %1412 = vmatpush.msra.mxu3 %v1256_v13  ;;  %v1245_v2 = vld [vmem:[#allocation8 + $0x280] sm:$0xff] }
 0x19a   : > { %1436 = vmatpush.msra.mxu0 %v1271_v3  ;;  %1459 = vmatpush.msra.mxu1 %v1287_v4  ;;  %v2908_v3 = vld [vmem:[%s3021_s7] sm:$0xff]  ;;  %v803_v4 = vpop.f32.mrf.mxu0 }
 0x19b   : > { %1390 = vmatpush.msrb.mxu2 %v1239_v16  ;;  %1413 = vmatpush.msra.mxu3 %v1255_v18  ;;  %v603_v9 = vperm.slane %v2908_v3, 3  ;;  %v780_v12 = vpop.f32.mrf.mxu3  ;;  %v601_v16 = vperm.slane %v2908_v3, 1 }
 0x19c   : > { %1437 = vmatpush.msra.mxu0 %v1270_v10  ;;  %1460 = vmatpush.msra.mxu1 %v1286_v11  ;;  %v602_v10 = vperm.slane %v2908_v3, 2  ;;  %v2913_v11 = vpop.f32.mrf.mxu2 }
 0x19d   : > { %1391 = vmatpush.msrb.mxu2 %v1238_v22  ;;  %1414 = vmatpush.msra.mxu3 %v1254_v23  ;;  %v709_v13 = vadd.f32 %v2888_v5, %v603_v9 }
 0x19e   : > { %1438 = vmatpush.msra.mxu0 %v1269_v14  ;;  %1461 = vmatpush.msra.mxu1 %v1285_v15  ;;  %v686_v14 = vadd.f32 %v2892_v7, %v602_v10  ;;  %v600_v15 = vperm.slane %v2908_v3, 0  ;;  %v712_v7 = vadd.f32 %v2894_v20, %v603_v9 }
 0x19f   : > { %1392 = vmatpush.msrb.mxu2 %v1237_v26  ;;  %1415 = vmatpush.msra.mxu3 %v1253_v28 }
 0x1a0   : > { %1439 = vmatpush.msra.mxu0 %v1268_v19  ;;  %1462 = vmatpush.msra.mxu1 %v1284_v21  ;;  %v640_v23 = vadd.f32 %v2860_v0, %v600_v15  ;;  %v606_v0 = vperm.slane %v2908_v3, 6 }
 0x1a1   : > { %1393 = vmatpush.msrb.mxu2 %v1236_v34  ;;  %1416 = vmatpush.msra.mxu3 %v1252_v35 }
 0x1a2   : > { %1440 = vmatpush.msra.mxu0 %v1267_v24  ;;  %1463 = vmatpush.msra.mxu1 %v1283_v25  ;;  %v663_v24 = vadd.f32 %v2890_v6, %v601_v16  ;;  %v643_v6 = vadd.f32 %v2862_v17, %v600_v15 }
 0x1a3   : > { %1394 = vmatpush.msrb.mxu2 %v1235_v39  ;;  %1417 = vmatpush.msra.mxu3 %v1251_v40  ;;  %v666_v39 = vadd.f32 %v2896_v32, %v601_v16 }
 0x1a4   : > { %1441 = vmatpush.msra.mxu0 %v1266_v30  ;;  %1464 = vmatpush.msra.mxu1 %v1282_v31  ;;  %v689_v30 = vadd.f32 %v2898_v33, %v602_v10 }
 0x1a5   : > { %1395 = vmatpush.msrb.mxu2 %v1234_v44  ;;  %1418 = vmatpush.msra.mxu3 %v1250_v45  ;;  %v778_v44 = vadd.f32 %v777_v59, %v606_v0  ;;  %v604_v45 = vperm.slane %v2908_v3, 4 }
 0x1a6   : > { %1442 = vmatpush.msra.mxu0 %v1265_v36  ;;  %1465 = vmatpush.msra.mxu1 %v1281_v37  ;;  %v607_v37 = vperm.slane %v2908_v3, 7 }
 0x1a7   : > { %1396 = vmatpush.msrb.mxu2 %v1233_v49  ;;  %1419 = vmatpush.msra.mxu3 %v1249_v50  ;;  %v732_v17 = vadd.f32 %v2864_v38, %v604_v45 }
 0x1a8   : > { %1443 = vmatpush.msra.mxu0 %v1264_v42  ;;  %1466 = vmatpush.msra.mxu1 %v1280_v43  ;;  %v801_v43 = vadd.f32 %v2900_v47, %v607_v37 }
 0x1a9   : > { %1397 = vmatpush.msrb.mxu2 %v1232_v53  ;;  %1420 = vmatpush.msra.mxu3 %v1248_v54 }
 0x1aa   : > { %1444 = vmatpush.msra.mxu0 %v1263_v46  ;;  %1467 = vmatpush.msra.mxu1 %v1279_v48  ;;  %v605_v46 = vperm.slane %v2908_v3, 5 }
 0x1ab   : > { %1398 = vmatpush.msrb.mxu2 %v1231_v60  ;;  %1421 = vmatpush.msra.mxu3 %v1247_v61 }
 0x1ac   : > { %1445 = vmatpush.msra.mxu0 %v1262_v51  ;;  %1468 = vmatpush.msra.mxu1 %v1278_v52  ;;  %v755_v32 = vadd.f32 %v2903_v58, %v605_v46  ;;  %v758_v38 = vadd.f32 %v2913_v11, %v605_v46 }
 0x1ad   : > { %1481 = vxpose.xlu0.b32.start [1/2] (short) (narrow) %v1479_v57, 16  ;;  %1399 = vmatpush.msrb.mxu2 %v1230_v62  ;;  %v735_v62 = vadd.f32 %v2866_v41, %v604_v45 }
 0x1ae   : > { %1446 = vmatpush.msra.mxu0 %v1261_v55  ;;  %1469 = vmatpush.msra.mxu1 %v1277_v56  ;;  %v804_v55 = vadd.f32 %v803_v4, %v607_v37  ;;  %v781_v56 = vadd.f32 %v780_v12, %v606_v0 }
 0x1af   : > { %1422 = vmatpush.msra.mxu3 %v1246_v63  ;;  %1400 = vmatpush.msrb.mxu2 %v1229_v1 }
 0x1b1   : > { %1423 = vmatpush.msra.mxu3 %v1245_v2 }
 0x1b5   : > { %1482 = vxpose.xlu0.b32.end [2/2] (short) (narrow) %v1480_v8, 16 }
 0x1e6   : > { %v1028_v18 = vpop.f32.mrf.mxu0  ;;  %v1051_v19 = vpop.f32.mrf.mxu1 }
 0x1e7   : > { %v1151_v21 = vmul.f32 %v1028_v18, %v686_v14  ;;  %v1152_v22 = vmul.f32 %v1051_v19, %v709_v13 }
 0x1e9   : > { %1355 = vmatmul.f32.vlgmr.msrb.gmra.mxu0 %v1151_v21  ;;  %1378 = vmatmul.f32.vlgmr.msrb.gmra.mxu1 %v1152_v22 }
 0x1eb   : > { %v982_v25 = vpop.f32.mrf.mxu2  ;;  %v1005_v26 = vpop.f32.mrf.mxu3 }
 0x1ec   : > { %v1149_v28 = vmul.f32 %v982_v25, %v640_v23  ;;  %v1150_v5 = vmul.f32 %v1005_v26, %v663_v24 }
 0x1ee   : > { %v1031_v31 = vpop.f32.mrf.mxu0  ;;  %v1054_v34 = vpop.f32.mrf.mxu1  ;;  %1309 = vmatmul.f32.vlgmr.msra.gmra.mxu2 %v1149_v28  ;;  %1332 = vmatmul.f32.vlgmr.msrb.gmra.mxu3 %v1150_v5 }
 0x1ef   : > { %v1159_v35 = vmul.f32 %v1031_v31, %v689_v30  ;;  %v1160_v36 = vmul.f32 %v1054_v34, %v712_v7 }
 0x1f1   : > { %1358 = vmatmul.f32.gmra.mxu0 %v1159_v35  ;;  %1381 = vmatmul.f32.gmra.mxu1 %v1160_v36 }
 0x1f3   : > { %v985_v40 = vpop.f32.mrf.mxu2  ;;  %v1008_v20 = vpop.f32.mrf.mxu3 }
 0x1f4   : > { %v1157_v42 = vmul.f32 %v985_v40, %v643_v6  ;;  %v1158_v33 = vmul.f32 %v1008_v20, %v666_v39  ;;  %v1477_v40 = vld [vmem:[#allocation2] sm:$0xff] }
 0x1f6   : > { %v1120_v48 = vpop.f32.mrf.mxu0  ;;  %v1143_v49 = vpop.f32.mrf.mxu1  ;;  %1312 = vmatmul.f32.gmra.mxu2 %v1157_v42  ;;  %1335 = vmatmul.f32.gmra.mxu3 %v1158_v33  ;;  %v1478_v33 = vld [vmem:[#allocation2 + $0x8] sm:$0xff] }
 0x1f7   : > { %v1155_v50 = vmul.f32 %v1120_v48, %v778_v44  ;;  %v1156_v51 = vmul.f32 %v1143_v49, %v801_v43 }
 0x1f9   : > { %1447 = vmatmul.f32.vlgmr.msra.gmra.mxu0 %v1155_v50  ;;  %1470 = vmatmul.f32.vlgmr.msra.gmra.mxu1 %v1156_v51 }
 0x1fb   : > { %v1074_v52 = vpop.f32.mrf.mxu2  ;;  %v1097_v53 = vpop.f32.mrf.mxu3 }
 0x1fc   : > { %v1153_v47 = vmul.f32 %v1074_v52, %v732_v17  ;;  %v1154_v54 = vmul.f32 %v1097_v53, %v755_v32 }
 0x1fe   : > { %v1123_v57 = vpop.f32.mrf.mxu0  ;;  %v1146_v59 = vpop.f32.mrf.mxu1  ;;  %1401 = vmatmul.f32.vlgmr.msrb.gmra.mxu2 %v1153_v47  ;;  %1424 = vmatmul.f32.vlgmr.msra.gmra.mxu3 %v1154_v54 }
 0x1ff   : > { %v1163_v60 = vmul.f32 %v1123_v57, %v781_v56  ;;  %v1164_v61 = vmul.f32 %v1146_v59, %v804_v55 }
 0x201   : > { %1450 = vmatmul.f32.gmra.mxu0 %v1163_v60  ;;  %1473 = vmatmul.f32.gmra.mxu1 %v1164_v61 }
 0x203   : > { %v1077_v63 = vpop.f32.mrf.mxu2  ;;  %v1100_v58 = vpop.f32.mrf.mxu3 }
 0x204   : > { %v1161_v1 = vmul.f32 %v1077_v63, %v735_v62  ;;  %v1162_v2 = vmul.f32 %v1100_v58, %v758_v38 }
 0x206   : > { %1404 = vmatmul.f32.gmra.mxu2 %v1161_v1  ;;  %1427 = vmatmul.f32.gmra.mxu3 %v1162_v2 }
 0x251   : > { %v1497_v0 = vpop.trf.xlu0 }
 0x259   : > { %v1498_v39 = vpop.trf.xlu0 }
 0x266   : > { %v1356_v3 = vpop.f32.mrf.mxu0  ;;  %v1379_v4 = vpop.f32.mrf.mxu1 }
 0x26e   : > { %v1359_v10 = vpop.f32.mrf.mxu0  ;;  %v1382_v14 = vpop.f32.mrf.mxu1 }
 0x271   : > { %v1310_v8 = vpop.f32.mrf.mxu2  ;;  %v1333_v9 = vpop.f32.mrf.mxu3 }
 0x272   : > { %v1334_v15 = vadd.f32 %v1333_v9, %v1310_v8 }
 0x274   : > { %v1357_v16 = vadd.f32 %v1356_v3, %v1334_v15 }
 0x276   : > { %v1448_v11 = vpop.f32.mrf.mxu0  ;;  %v1380_v22 = vadd.f32 %v1379_v4, %v1357_v16  ;;  %v1471_v23 = vpop.f32.mrf.mxu1 }
 0x279   : > { %v1313_v12 = vpop.f32.mrf.mxu2  ;;  %v1336_v13 = vpop.f32.mrf.mxu3 }
 0x27a   : > { %v1337_v18 = vadd.f32 %v1336_v13, %v1313_v12 }
 0x27c   : > { %v1360_v21 = vadd.f32 %v1359_v10, %v1337_v18 }
 0x27e   : > { %v1383_v25 = vadd.f32 %v1382_v14, %v1360_v21  ;;  %v1451_v31 = vpop.f32.mrf.mxu0  ;;  %v1474_v36 = vpop.f32.mrf.mxu1 }
 0x281   : > { %v1402_v41 = vpop.f32.mrf.mxu2  ;;  %v1425_v19 = vpop.f32.mrf.mxu3 }
 0x282   : > { %v1403_v24 = vadd.f32 %v1402_v41, %v1380_v22 }
 0x284   : > { %v1426_v28 = vadd.f32 %v1425_v19, %v1403_v24 }
 0x286   : > { %v1449_v34 = vadd.f32 %v1448_v11, %v1426_v28 }
 0x288   : > { %v1472_v6 = vadd.f32 %v1471_v23, %v1449_v34 }
 0x289   : > { %v1405_v26 = vpop.f32.mrf.mxu2  ;;  %v1428_v7 = vpop.f32.mrf.mxu3 }
 0x28a   : > { %v1406_v5 = vadd.f32 %v1405_v26, %v1383_v25 }
 0x28c   : > { %v1429_v30 = vadd.f32 %v1428_v7, %v1406_v5 }
 0x28e   : > { %v1452_v35 = vadd.f32 %v1451_v31, %v1429_v30 }
 0x290   : > { %v1475_v37 = vadd.f32 %v1474_v36, %v1452_v35 }
 0x292   : > { %1533 = vmatpush.msra.mxu2 %v1475_v37 }
 0x294   : > { %1534 = vmatpush.msra.mxu2 %v1472_v6 }
 0x295   : > { %2298 = vmatmul.msk.f32.vlgmr.msra.gmra.mxu2 %vm550_vm0, %v1497_v0 }
 0x29d   : > { %2299 = vmatmul.msk.f32.gmra.mxu2 %vm550_vm0, %v1498_v39 }
 0x318   : > { %v1536_v20 = vpop.f32.mrf.mxu2 }
 0x319   : > { %v1542_v42 = vadd.f32 %v1536_v20, %v1477_v40 }
 0x31b   : > { %1544 = vst [vmem:[#allocation2] sm:$0xff] %v1542_v42 }
 0x31f   : > { %1549 = sbr.rel (%p2300_p13) target bundleno = 1083 (0x43b), region = 96 }
 0x320   : > { %v1539_v43 = vpop.f32.mrf.mxu2 }
 0x321   : > { %v1543_v44 = vadd.f32 %v1539_v43, %v1478_v33 }
 0x323   : > { %1545 = vst [vmem:[#allocation2 + $0x8] sm:$0xff] %v1543_v44 }
 0x324   : > { %v1644_v45 = vld [vmem:[#allocation9 + $0x2d0] sm:$0xff]  ;;  %v1645_v46 = vld [vmem:[#allocation9 + $0x2d8] sm:$0xff]  ;;  %v1638_v48 = vld [vmem:[#allocation9 + $0x2a0] sm:$0xff] }
 0x325   : > { %1760 = vmatpush.msra.mxu0 %v1644_v45  ;;  %1806 = vmatpush.msra.mxu2 %v1645_v46  ;;  %v1740_v49 = vld [vmem:[#allocation9 + $0x5d0] sm:$0xff]  ;;  %v1639_v50 = vld [vmem:[#allocation9 + $0x2a8] sm:$0xff]  ;;  %v1741_v51 = vld [vmem:[#allocation9 + $0x5d8] sm:$0xff] }
 0x326   : > { %1783 = vmatpush.msra.mxu1 %v1740_v49  ;;  %1829 = vmatpush.msra.mxu3 %v1741_v51  ;;  %v1632_v17 = vld [vmem:[#allocation9 + $0x270] sm:$0xff]  ;;  %v1734_v32 = vld [vmem:[#allocation9 + $0x5a0] sm:$0xff]  ;;  %v1633_v52 = vld [vmem:[#allocation9 + $0x278] sm:$0xff] }
 0x327   : > { %1761 = vmatpush.msra.mxu0 %v1638_v48  ;;  %1807 = vmatpush.msra.mxu2 %v1639_v50  ;;  %v1735_v53 = vld [vmem:[#allocation9 + $0x5a8] sm:$0xff]  ;;  %v1728_v47 = vld [vmem:[#allocation9 + $0x570] sm:$0xff]  ;;  %v1626_v54 = vld [vmem:[#allocation9 + $0x240] sm:$0xff] }
 0x328   : > { %1784 = vmatpush.msra.mxu1 %v1734_v32  ;;  %1830 = vmatpush.msra.mxu3 %v1735_v53  ;;  %v1627_v55 = vld [vmem:[#allocation9 + $0x248] sm:$0xff]  ;;  %v1729_v56 = vld [vmem:[#allocation9 + $0x578] sm:$0xff]  ;;  %v1722_v57 = vld [vmem:[#allocation9 + $0x540] sm:$0xff] }
 0x329   : > { %1762 = vmatpush.msra.mxu0 %v1632_v17  ;;  %1808 = vmatpush.msra.mxu2 %v1633_v52  ;;  %v1723_v59 = vld [vmem:[#allocation9 + $0x548] sm:$0xff]  ;;  %v1620_v60 = vld [vmem:[#allocation9 + $0x210] sm:$0xff]  ;;  %v1621_v61 = vld [vmem:[#allocation9 + $0x218] sm:$0xff] }
 0x32a   : > { %1785 = vmatpush.msra.mxu1 %v1728_v47  ;;  %1831 = vmatpush.msra.mxu3 %v1729_v56  ;;  %v1716_v62 = vld [vmem:[#allocation9 + $0x510] sm:$0xff]  ;;  %v1717_v38 = vld [vmem:[#allocation9 + $0x518] sm:$0xff]  ;;  %v1614_v63 = vld [vmem:[#allocation9 + $0x1e0] sm:$0xff] }
 0x32b   : > { %1763 = vmatpush.msra.mxu0 %v1626_v54  ;;  %1809 = vmatpush.msra.mxu2 %v1627_v55  ;;  %v1615_v58 = vld [vmem:[#allocation9 + $0x1e8] sm:$0xff]  ;;  %v1710_v1 = vld [vmem:[#allocation9 + $0x4e0] sm:$0xff]  ;;  %v1608_v3 = vld [vmem:[#allocation9 + $0x1b0] sm:$0xff] }
 0x32c   : > { %1786 = vmatpush.msra.mxu1 %v1722_v57  ;;  %1832 = vmatpush.msra.mxu3 %v1723_v59  ;;  %v1711_v2 = vld [vmem:[#allocation9 + $0x4e8] sm:$0xff]  ;;  %v1609_v4 = vld [vmem:[#allocation9 + $0x1b8] sm:$0xff]  ;;  %v1704_v8 = vld [vmem:[#allocation9 + $0x4b0] sm:$0xff] }
 0x32d   : > { %1764 = vmatpush.msra.mxu0 %v1620_v60  ;;  %1810 = vmatpush.msra.mxu2 %v1621_v61  ;;  %v1705_v9 = vld [vmem:[#allocation9 + $0x4b8] sm:$0xff]  ;;  %v1602_v10 = vld [vmem:[#allocation9 + $0x180] sm:$0xff]  ;;  %v1603_v12 = vld [vmem:[#allocation9 + $0x188] sm:$0xff] }
 0x32e   : > { %1787 = vmatpush.msra.mxu1 %v1716_v62  ;;  %1833 = vmatpush.msra.mxu3 %v1717_v38  ;;  %v1698_v13 = vld [vmem:[#allocation9 + $0x480] sm:$0xff]  ;;  %v1699_v14 = vld [vmem:[#allocation9 + $0x488] sm:$0xff]  ;;  %v1596_v15 = vld [vmem:[#allocation9 + $0x150] sm:$0xff] }
 0x32f   : > { %1765 = vmatpush.msra.mxu0 %v1614_v63  ;;  %1811 = vmatpush.msra.mxu2 %v1615_v58  ;;  %v1597_v16 = vld [vmem:[#allocation9 + $0x158] sm:$0xff]  ;;  %v1692_v18 = vld [vmem:[#allocation9 + $0x450] sm:$0xff]  ;;  %v1590_v19 = vld [vmem:[#allocation9 + $0x120] sm:$0xff] }
 0x330   : > { %1788 = vmatpush.msra.mxu1 %v1710_v1  ;;  %1834 = vmatpush.msra.mxu3 %v1711_v2  ;;  %v1693_v41 = vld [vmem:[#allocation9 + $0x458] sm:$0xff]  ;;  %v1591_v11 = vld [vmem:[#allocation9 + $0x128] sm:$0xff]  ;;  %v1686_v21 = vld [vmem:[#allocation9 + $0x420] sm:$0xff] }
 0x331   : > { %1766 = vmatpush.msra.mxu0 %v1608_v3  ;;  %1812 = vmatpush.msra.mxu2 %v1609_v4  ;;  %v1687_v22 = vld [vmem:[#allocation9 + $0x428] sm:$0xff]  ;;  %v1584_v23 = vld [vmem:[#allocation9 + $0xf0] sm:$0xff]  ;;  %v1585_v24 = vld [vmem:[#allocation9 + $0xf8] sm:$0xff] }
 0x332   : > { %1789 = vmatpush.msra.mxu1 %v1704_v8  ;;  %1835 = vmatpush.msra.mxu3 %v1705_v9  ;;  %v1680_v25 = vld [vmem:[#allocation9 + $0x3f0] sm:$0xff]  ;;  %v1681_v26 = vld [vmem:[#allocation9 + $0x3f8] sm:$0xff]  ;;  %v1578_v28 = vld [vmem:[#allocation9 + $0xc0] sm:$0xff] }
 0x333   : > { %1767 = vmatpush.msra.mxu0 %v1602_v10  ;;  %1813 = vmatpush.msra.mxu2 %v1603_v12  ;;  %v1579_v5 = vld [vmem:[#allocation9 + $0xc8] sm:$0xff]  ;;  %v1674_v7 = vld [vmem:[#allocation9 + $0x3c0] sm:$0xff]  ;;  %v1572_v31 = vld [vmem:[#allocation9 + $0x90] sm:$0xff] }
 0x334   : > { %1790 = vmatpush.msra.mxu1 %v1698_v13  ;;  %1836 = vmatpush.msra.mxu3 %v1699_v14  ;;  %v1675_v30 = vld [vmem:[#allocation9 + $0x3c8] sm:$0xff]  ;;  %v1573_v34 = vld [vmem:[#allocation9 + $0x98] sm:$0xff]  ;;  %v1668_v35 = vld [vmem:[#allocation9 + $0x390] sm:$0xff] }
 0x335   : > { %1768 = vmatpush.msra.mxu0 %v1596_v15  ;;  %1814 = vmatpush.msra.mxu2 %v1597_v16  ;;  %v1669_v36 = vld [vmem:[#allocation9 + $0x398] sm:$0xff]  ;;  %v1566_v37 = vld [vmem:[#allocation9 + $0x60] sm:$0xff]  ;;  %v1567_v0 = vld [vmem:[#allocation9 + $0x68] sm:$0xff] }
 0x336   : > { %1791 = vmatpush.msra.mxu1 %v1692_v18  ;;  %1837 = vmatpush.msra.mxu3 %v1693_v41  ;;  %v1662_v6 = vld [vmem:[#allocation9 + $0x360] sm:$0xff]  ;;  %v1663_v39 = vld [vmem:[#allocation9 + $0x368] sm:$0xff]  ;;  %v1560_v40 = vld [vmem:[#allocation9 + $0x30] sm:$0xff] }
 0x337   : > { %1769 = vmatpush.msra.mxu0 %v1590_v19  ;;  %1815 = vmatpush.msra.mxu2 %v1591_v11  ;;  %v1561_v20 = vld [vmem:[#allocation9 + $0x38] sm:$0xff]  ;;  %v1656_v42 = vld [vmem:[#allocation9 + $0x330] sm:$0xff]  ;;  %v1554_v43 = vld [vmem:[#allocation9] sm:$0xff] }
 0x338   : > { %1792 = vmatpush.msra.mxu1 %v1686_v21  ;;  %1838 = vmatpush.msra.mxu3 %v1687_v22  ;;  %v1657_v33 = vld [vmem:[#allocation9 + $0x338] sm:$0xff]  ;;  %v1555_v44 = vld [vmem:[#allocation9 + $0x8] sm:$0xff]  ;;  %v1646_v45 = vld [vmem:[#allocation9 + $0x2e0] sm:$0xff] }
 0x339   : > { %1770 = vmatpush.msra.mxu0 %v1584_v23  ;;  %1816 = vmatpush.msra.mxu2 %v1585_v24  ;;  %v1647_v46 = vld [vmem:[#allocation9 + $0x2e8] sm:$0xff]  ;;  %v1650_v48 = vld [vmem:[#allocation9 + $0x300] sm:$0xff]  ;;  %v1640_v50 = vld [vmem:[#allocation9 + $0x2b0] sm:$0xff] }
 0x33a   : > { %1793 = vmatpush.msra.mxu1 %v1680_v25  ;;  %1839 = vmatpush.msra.mxu3 %v1681_v26  ;;  %v1651_v49 = vld [vmem:[#allocation9 + $0x308] sm:$0xff]  ;;  %v1742_v51 = vld [vmem:[#allocation9 + $0x5e0] sm:$0xff]  ;;  %v1641_v17 = vld [vmem:[#allocation9 + $0x2b8] sm:$0xff] }
 0x33b   : > { %1771 = vmatpush.msra.mxu0 %v1578_v28  ;;  %1817 = vmatpush.msra.mxu2 %v1579_v5  ;;  %v1743_v32 = vld [vmem:[#allocation9 + $0x5e8] sm:$0xff]  ;;  %v1634_v52 = vld [vmem:[#allocation9 + $0x280] sm:$0xff]  ;;  %v1736_v53 = vld [vmem:[#allocation9 + $0x5b0] sm:$0xff] }
 0x33c   : > { %1794 = vmatpush.msra.mxu1 %v1674_v7  ;;  %1840 = vmatpush.msra.mxu3 %v1675_v30  ;;  %v1635_v47 = vld [vmem:[#allocation9 + $0x288] sm:$0xff]  ;;  %v1737_v54 = vld [vmem:[#allocation9 + $0x5b8] sm:$0xff]  ;;  %v1628_v55 = vld [vmem:[#allocation9 + $0x250] sm:$0xff] }
 0x33d   : > { %1772 = vmatpush.msra.mxu0 %v1572_v31  ;;  %1818 = vmatpush.msra.mxu2 %v1573_v34  ;;  %v1730_v56 = vld [vmem:[#allocation9 + $0x580] sm:$0xff]  ;;  %v1629_v57 = vld [vmem:[#allocation9 + $0x258] sm:$0xff]  ;;  %v1731_v59 = vld [vmem:[#allocation9 + $0x588] sm:$0xff] }
 0x33e   : > { %1795 = vmatpush.msra.mxu1 %v1668_v35  ;;  %1841 = vmatpush.msra.mxu3 %v1669_v36  ;;  %v1622_v60 = vld [vmem:[#allocation9 + $0x220] sm:$0xff]  ;;  %v1724_v61 = vld [vmem:[#allocation9 + $0x550] sm:$0xff]  ;;  %v1623_v62 = vld [vmem:[#allocation9 + $0x228] sm:$0xff] }
 0x33f   : > { %1773 = vmatpush.msra.mxu0 %v1566_v37  ;;  %1819 = vmatpush.msra.mxu2 %v1567_v0  ;;  %v1725_v38 = vld [vmem:[#allocation9 + $0x558] sm:$0xff]  ;;  %v1616_v63 = vld [vmem:[#allocation9 + $0x1f0] sm:$0xff]  ;;  %v1718_v58 = vld [vmem:[#allocation9 + $0x520] sm:$0xff] }
 0x340   : > { %1796 = vmatpush.msra.mxu1 %v1662_v6  ;;  %1842 = vmatpush.msra.mxu3 %v1663_v39  ;;  %v1617_v1 = vld [vmem:[#allocation9 + $0x1f8] sm:$0xff]  ;;  %v1719_v2 = vld [vmem:[#allocation9 + $0x528] sm:$0xff]  ;;  %v1610_v3 = vld [vmem:[#allocation9 + $0x1c0] sm:$0xff] }
 0x341   : > { %1774 = vmatpush.msra.mxu0 %v1560_v40  ;;  %1820 = vmatpush.msra.mxu2 %v1561_v20  ;;  %v1712_v4 = vld [vmem:[#allocation9 + $0x4f0] sm:$0xff]  ;;  %v1611_v9 = vld [vmem:[#allocation9 + $0x1c8] sm:$0xff]  ;;  %v1713_v10 = vld [vmem:[#allocation9 + $0x4f8] sm:$0xff] }
 0x342   : > { %1797 = vmatpush.msra.mxu1 %v1656_v42  ;;  %1843 = vmatpush.msra.mxu3 %v1657_v33  ;;  %v1550_v8 = vld [vmem:[#allocation2] sm:$0xff]  ;;  %v1706_v13 = vld [vmem:[#allocation9 + $0x4c0] sm:$0xff]  ;;  %v1605_v14 = vld [vmem:[#allocation9 + $0x198] sm:$0xff] }
 0x343   : > { %1775 = vmatpush.msra.mxu0 %v1554_v43  ;;  %1821 = vmatpush.msra.mxu2 %v1555_v44  ;;  %v1604_v12 = vld [vmem:[#allocation9 + $0x190] sm:$0xff]  ;;  %v1707_v15 = vld [vmem:[#allocation9 + $0x4c8] sm:$0xff]  ;;  %v2937_v16 = vmax.f32 %v1550_v8, 0.0  ;;  %v1598_v18 = vld [vmem:[#allocation9 + $0x160] sm:$0xff] }
 0x344   : > { %1798 = vmatpush.msra.mxu1 %v1650_v48  ;;  %1844 = vmatpush.msra.mxu3 %v1651_v49  ;;  %v1700_v41 = vld [vmem:[#allocation9 + $0x490] sm:$0xff]  ;;  %v1599_v19 = vld [vmem:[#allocation9 + $0x168] sm:$0xff]  ;;  %v1701_v11 = vld [vmem:[#allocation9 + $0x498] sm:$0xff] }
 0x345   : > { %1852 = vmatpush.msrb.mxu0 %v1646_v45  ;;  %1898 = vmatpush.msrb.mxu2 %v1647_v46  ;;  %v1592_v21 = vld [vmem:[#allocation9 + $0x130] sm:$0xff]  ;;  %v1694_v22 = vld [vmem:[#allocation9 + $0x460] sm:$0xff]  ;;  %v1593_v23 = vld [vmem:[#allocation9 + $0x138] sm:$0xff] }
 0x346   : > { %1875 = vmatpush.msrb.mxu1 %v1742_v51  ;;  %1921 = vmatpush.msrb.mxu3 %v1743_v32  ;;  %v1695_v24 = vld [vmem:[#allocation9 + $0x468] sm:$0xff]  ;;  %v1586_v25 = vld [vmem:[#allocation9 + $0x100] sm:$0xff]  ;;  %v1688_v26 = vld [vmem:[#allocation9 + $0x430] sm:$0xff] }
 0x347   : > { %1853 = vmatpush.msrb.mxu0 %v1640_v50  ;;  %1899 = vmatpush.msrb.mxu2 %v1641_v17  ;;  %v1551_v28 = vld [vmem:[#allocation2 + $0x8] sm:$0xff]  ;;  %v1587_v5 = vld [vmem:[#allocation9 + $0x108] sm:$0xff]  ;;  %v1580_v30 = vld [vmem:[#allocation9 + $0xd0] sm:$0xff] }
 0x348   : > { %1876 = vmatpush.msrb.mxu1 %v1736_v53  ;;  %1922 = vmatpush.msrb.mxu3 %v1737_v54  ;;  %v1689_v7 = vld [vmem:[#allocation9 + $0x438] sm:$0xff]  ;;  %v1682_v31 = vld [vmem:[#allocation9 + $0x400] sm:$0xff]  ;;  %v1683_v35 = vld [vmem:[#allocation9 + $0x408] sm:$0xff]  ;;  %v2941_v36 = vmax.f32 %v1551_v28, 0.0 }
 0x349   : > { %1854 = vmatpush.msrb.mxu0 %v1634_v52  ;;  %1900 = vmatpush.msrb.mxu2 %v1635_v47  ;;  %v1581_v34 = vld [vmem:[#allocation9 + $0xd8] sm:$0xff]  ;;  %v1574_v37 = vld [vmem:[#allocation9 + $0xa0] sm:$0xff]  ;;  %v1676_v0 = vld [vmem:[#allocation9 + $0x3d0] sm:$0xff] }
 0x34a   : > { %1877 = vmatpush.msrb.mxu1 %v1730_v56  ;;  %1923 = vmatpush.msrb.mxu3 %v1731_v59  ;;  %v1575_v6 = vld [vmem:[#allocation9 + $0xa8] sm:$0xff]  ;;  %v1677_v39 = vld [vmem:[#allocation9 + $0x3d8] sm:$0xff]  ;;  %v1568_v40 = vld [vmem:[#allocation9 + $0x70] sm:$0xff] }
 0x34b   : > { %1855 = vmatpush.msrb.mxu0 %v1628_v55  ;;  %1901 = vmatpush.msrb.mxu2 %v1629_v57  ;;  %v1670_v20 = vld [vmem:[#allocation9 + $0x3a0] sm:$0xff]  ;;  %v1569_v42 = vld [vmem:[#allocation9 + $0x78] sm:$0xff]  ;;  %v1671_v33 = vld [vmem:[#allocation9 + $0x3a8] sm:$0xff] }
 0x34c   : > { %1878 = vmatpush.msrb.mxu1 %v1724_v61  ;;  %1924 = vmatpush.msrb.mxu3 %v1725_v38  ;;  %v1562_v43 = vld [vmem:[#allocation9 + $0x40] sm:$0xff]  ;;  %v1664_v44 = vld [vmem:[#allocation9 + $0x370] sm:$0xff]  ;;  %v1563_v45 = vld [vmem:[#allocation9 + $0x48] sm:$0xff] }
 0x34d   : > { %1856 = vmatpush.msrb.mxu0 %v1622_v60  ;;  %1902 = vmatpush.msrb.mxu2 %v1623_v62  ;;  %v1665_v46 = vld [vmem:[#allocation9 + $0x378] sm:$0xff]  ;;  %v1658_v48 = vld [vmem:[#allocation9 + $0x340] sm:$0xff]  ;;  %v1556_v49 = vld [vmem:[#allocation9 + $0x10] sm:$0xff] }
 0x34e   : > { %1879 = vmatpush.msrb.mxu1 %v1718_v58  ;;  %1925 = vmatpush.msrb.mxu3 %v1719_v2  ;;  %v1557_v50 = vld [vmem:[#allocation9 + $0x18] sm:$0xff]  ;;  %v1659_v51 = vld [vmem:[#allocation9 + $0x348] sm:$0xff]  ;;  %v1648_v17 = vld [vmem:[#allocation9 + $0x2f0] sm:$0xff] }
 0x34f   : > { %1857 = vmatpush.msrb.mxu0 %v1616_v63  ;;  %1903 = vmatpush.msrb.mxu2 %v1617_v1  ;;  %v1649_v32 = vld [vmem:[#allocation9 + $0x2f8] sm:$0xff]  ;;  %v1652_v53 = vld [vmem:[#allocation9 + $0x310] sm:$0xff]  ;;  %v1642_v47 = vld [vmem:[#allocation9 + $0x2c0] sm:$0xff] }
 0x350   : > { %1880 = vmatpush.msrb.mxu1 %v1712_v4  ;;  %1926 = vmatpush.msrb.mxu3 %v1713_v10  ;;  %v1653_v52 = vld [vmem:[#allocation9 + $0x318] sm:$0xff]  ;;  %v1744_v54 = vld [vmem:[#allocation9 + $0x5f0] sm:$0xff]  ;;  %v1643_v55 = vld [vmem:[#allocation9 + $0x2c8] sm:$0xff] }
 0x351   : > { %1858 = vmatpush.msrb.mxu0 %v1610_v3  ;;  %1904 = vmatpush.msrb.mxu2 %v1611_v9  ;;  %v1745_v56 = vld [vmem:[#allocation9 + $0x5f8] sm:$0xff]  ;;  %v1636_v57 = vld [vmem:[#allocation9 + $0x290] sm:$0xff]  ;;  %v1738_v59 = vld [vmem:[#allocation9 + $0x5c0] sm:$0xff] }
 0x352   : > { %1881 = vmatpush.msrb.mxu1 %v1706_v13  ;;  %1927 = vmatpush.msrb.mxu3 %v1707_v15  ;;  %v1637_v60 = vld [vmem:[#allocation9 + $0x298] sm:$0xff]  ;;  %v1739_v61 = vld [vmem:[#allocation9 + $0x5c8] sm:$0xff]  ;;  %v1630_v62 = vld [vmem:[#allocation9 + $0x260] sm:$0xff] }
 0x353   : > { %1859 = vmatpush.msrb.mxu0 %v1604_v12  ;;  %1905 = vmatpush.msrb.mxu2 %v1605_v14  ;;  %v1732_v38 = vld [vmem:[#allocation9 + $0x590] sm:$0xff]  ;;  %v1631_v63 = vld [vmem:[#allocation9 + $0x268] sm:$0xff]  ;;  %v1733_v58 = vld [vmem:[#allocation9 + $0x598] sm:$0xff] }
 0x354   : > { %1822 = vmatmul.f32.vlgmr.msra.gmra.mxu2 %v2937_v16  ;;  %1882 = vmatpush.msrb.mxu1 %v1700_v41  ;;  %v1624_v1 = vld [vmem:[#allocation9 + $0x230] sm:$0xff]  ;;  %v1726_v2 = vld [vmem:[#allocation9 + $0x560] sm:$0xff]  ;;  %v1625_v3 = vld [vmem:[#allocation9 + $0x238] sm:$0xff] }
 0x355   : > { %1860 = vmatpush.msrb.mxu0 %v1598_v18  ;;  %1906 = vmatpush.msrb.mxu2 %v1599_v19  ;;  %v1727_v4 = vld [vmem:[#allocation9 + $0x568] sm:$0xff]  ;;  %v1618_v8 = vld [vmem:[#allocation9 + $0x200] sm:$0xff]  ;;  %v1720_v9 = vld [vmem:[#allocation9 + $0x530] sm:$0xff] }
 0x356   : > { %1928 = vmatpush.msrb.mxu3 %v1701_v11  ;;  %1883 = vmatpush.msrb.mxu1 %v1694_v22  ;;  %v1619_v10 = vld [vmem:[#allocation9 + $0x208] sm:$0xff]  ;;  %v1721_v12 = vld [vmem:[#allocation9 + $0x538] sm:$0xff]  ;;  %v1612_v13 = vld [vmem:[#allocation9 + $0x1d0] sm:$0xff] }
 0x357   : > { %1861 = vmatpush.msrb.mxu0 %v1592_v21  ;;  %1845 = vmatmul.f32.vlgmr.msra.gmra.mxu3 %v2840_v29  ;;  %v1714_v14 = vld [vmem:[#allocation9 + $0x500] sm:$0xff]  ;;  %v1613_v15 = vld [vmem:[#allocation9 + $0x1d8] sm:$0xff]  ;;  %v1715_v18 = vld [vmem:[#allocation9 + $0x508] sm:$0xff] }
 0x358   : > { %1907 = vmatpush.msrb.mxu2 %v1593_v23  ;;  %1929 = vmatpush.msrb.mxu3 %v1695_v24  ;;  %v1606_v41 = vld [vmem:[#allocation9 + $0x1a0] sm:$0xff]  ;;  %v1708_v19 = vld [vmem:[#allocation9 + $0x4d0] sm:$0xff]  ;;  %v1607_v11 = vld [vmem:[#allocation9 + $0x1a8] sm:$0xff] }
 0x359   : > { %1862 = vmatpush.msrb.mxu0 %v1586_v25  ;;  %1884 = vmatpush.msrb.mxu1 %v1688_v26  ;;  %v1709_v21 = vld [vmem:[#allocation9 + $0x4d8] sm:$0xff]  ;;  %v1702_v22 = vld [vmem:[#allocation9 + $0x4a0] sm:$0xff]  ;;  %v1600_v23 = vld [vmem:[#allocation9 + $0x170] sm:$0xff] }
 0x35a   : > { %1908 = vmatpush.msrb.mxu2 %v1587_v5  ;;  %1930 = vmatpush.msrb.mxu3 %v1689_v7  ;;  %v1601_v24 = vld [vmem:[#allocation9 + $0x178] sm:$0xff]  ;;  %v1703_v25 = vld [vmem:[#allocation9 + $0x4a8] sm:$0xff]  ;;  %v1594_v26 = vld [vmem:[#allocation9 + $0x140] sm:$0xff] }
 0x35b   : > { %1863 = vmatpush.msrb.mxu0 %v1580_v30  ;;  %1885 = vmatpush.msrb.mxu1 %v1682_v31  ;;  %v1696_v28 = vld [vmem:[#allocation9 + $0x470] sm:$0xff]  ;;  %v1595_v5 = vld [vmem:[#allocation9 + $0x148] sm:$0xff]  ;;  %v1697_v7 = vld [vmem:[#allocation9 + $0x478] sm:$0xff] }
 0x35c   : > { %1909 = vmatpush.msrb.mxu2 %v1581_v34  ;;  %1931 = vmatpush.msrb.mxu3 %v1683_v35  ;;  %v1588_v30 = vld [vmem:[#allocation9 + $0x110] sm:$0xff]  ;;  %v1690_v31 = vld [vmem:[#allocation9 + $0x440] sm:$0xff]  ;;  %v1589_v34 = vld [vmem:[#allocation9 + $0x118] sm:$0xff] }
 0x35d   : > { %1825 = vmatmul.f32.gmra.mxu2 %v2941_v36  ;;  %1864 = vmatpush.msrb.mxu0 %v1574_v37  ;;  %v1691_v35 = vld [vmem:[#allocation9 + $0x448] sm:$0xff]  ;;  %v1582_v37 = vld [vmem:[#allocation9 + $0xe0] sm:$0xff] }
 0x35e   : > { %1886 = vmatpush.msrb.mxu1 %v1676_v0  ;;  %1910 = vmatpush.msrb.mxu2 %v1575_v6  ;;  %v1684_v0 = vld [vmem:[#allocation9 + $0x410] sm:$0xff]  ;;  %v1583_v6 = vld [vmem:[#allocation9 + $0xe8] sm:$0xff] }
 0x35f   : > { %1932 = vmatpush.msrb.mxu3 %v1677_v39  ;;  %1865 = vmatpush.msrb.mxu0 %v1568_v40  ;;  %v1685_v39 = vld [vmem:[#allocation9 + $0x418] sm:$0xff]  ;;  %v1678_v40 = vld [vmem:[#allocation9 + $0x3e0] sm:$0xff] }
 0x360   : > { %1848 = vmatmul.f32.gmra.mxu3 %v2834_v27  ;;  %1887 = vmatpush.msrb.mxu1 %v1670_v20  ;;  %v1576_v20 = vld [vmem:[#allocation9 + $0xb0] sm:$0xff] }
 0x361   : > { %1911 = vmatpush.msrb.mxu2 %v1569_v42  ;;  %1933 = vmatpush.msrb.mxu3 %v1671_v33  ;;  %v1577_v42 = vld [vmem:[#allocation9 + $0xb8] sm:$0xff]  ;;  %v1679_v33 = vld [vmem:[#allocation9 + $0x3e8] sm:$0xff] }
 0x362   : > { %1866 = vmatpush.msrb.mxu0 %v1562_v43  ;;  %1888 = vmatpush.msrb.mxu1 %v1664_v44  ;;  %v1570_v43 = vld [vmem:[#allocation9 + $0x80] sm:$0xff]  ;;  %v1672_v44 = vld [vmem:[#allocation9 + $0x3b0] sm:$0xff] }
 0x363   : > { %1912 = vmatpush.msrb.mxu2 %v1563_v45  ;;  %1934 = vmatpush.msrb.mxu3 %v1665_v46  ;;  %v1571_v45 = vld [vmem:[#allocation9 + $0x88] sm:$0xff]  ;;  %v1673_v46 = vld [vmem:[#allocation9 + $0x3b8] sm:$0xff] }
 0x364   : > { %1776 = vmatmul.f32.vlgmr.msra.gmra.mxu0 %v2937_v16  ;;  %1889 = vmatpush.msrb.mxu1 %v1658_v48  ;;  %v1564_v48 = vld [vmem:[#allocation9 + $0x50] sm:$0xff] }
 0x365   : > { %1867 = vmatpush.msrb.mxu0 %v1556_v49  ;;  %1913 = vmatpush.msrb.mxu2 %v1557_v50  ;;  %v1666_v49 = vld [vmem:[#allocation9 + $0x380] sm:$0xff]  ;;  %v1565_v50 = vld [vmem:[#allocation9 + $0x58] sm:$0xff] }
 0x366   : > { %1935 = vmatpush.msrb.mxu3 %v1659_v51  ;;  %1914 = vmatmul.f32.vlgmr.msrb.gmra.mxu2 %v2937_v16  ;;  %v1667_v51 = vld [vmem:[#allocation9 + $0x388] sm:$0xff] }
 0x367   : > { %1944 = vmatpush.msra.mxu0 %v1648_v17  ;;  %1990 = vmatpush.msra.mxu2 %v1649_v32  ;;  %v1558_v17 = vld [vmem:[#allocation9 + $0x20] sm:$0xff]  ;;  %v1660_v32 = vld [vmem:[#allocation9 + $0x350] sm:$0xff] }
 0x368   : > { %1799 = vmatmul.f32.vlgmr.msra.gmra.mxu1 %v2840_v29  ;;  %1936 = vmatpush.msrb.mxu3 %v1653_v52  ;;  %v1559_v52 = vld [vmem:[#allocation9 + $0x28] sm:$0xff] }
 0x369   : > { %1890 = vmatpush.msrb.mxu1 %v1652_v53  ;;  %1937 = vmatmul.f32.vlgmr.msrb.gmra.mxu3 %v2840_v29  ;;  %v1661_v53 = vld [vmem:[#allocation9 + $0x358] sm:$0xff] }
 0x36a   : > { %1945 = vmatpush.msra.mxu0 %v1642_v47  ;;  %1991 = vmatpush.msra.mxu2 %v1643_v55  ;;  %v1654_v47 = vld [vmem:[#allocation9 + $0x320] sm:$0xff] }
 0x36b   : > { %1967 = vmatpush.msra.mxu1 %v1744_v54  ;;  %2013 = vmatpush.msra.mxu3 %v1745_v56  ;;  %v1655_v54 = vld [vmem:[#allocation9 + $0x328] sm:$0xff] }
 0x36c   : > { %1946 = vmatpush.msra.mxu0 %v1636_v57  ;;  %1992 = vmatpush.msra.mxu2 %v1637_v60 }
 0x36d   : > { %1968 = vmatpush.msra.mxu1 %v1738_v59  ;;  %2014 = vmatpush.msra.mxu3 %v1739_v61 }
 0x36e   : > { %1947 = vmatpush.msra.mxu0 %v1630_v62  ;;  %1993 = vmatpush.msra.mxu2 %v1631_v63 }
 0x36f   : > { %1969 = vmatpush.msra.mxu1 %v1732_v38  ;;  %2015 = vmatpush.msra.mxu3 %v1733_v58 }
 0x370   : > { %1779 = vmatmul.f32.gmra.mxu0 %v2941_v36  ;;  %1917 = vmatmul.f32.gmra.mxu2 %v2941_v36 }
 0x371   : > { %1948 = vmatpush.msra.mxu0 %v1624_v1  ;;  %1970 = vmatpush.msra.mxu1 %v1726_v2 }
 0x372   : > { %1994 = vmatpush.msra.mxu2 %v1625_v3  ;;  %2016 = vmatpush.msra.mxu3 %v1727_v4 }
 0x373   : > { %1802 = vmatmul.f32.gmra.mxu1 %v2834_v27  ;;  %1940 = vmatmul.f32.gmra.mxu3 %v2834_v27 }
 0x374   : > { %1949 = vmatpush.msra.mxu0 %v1618_v8  ;;  %1971 = vmatpush.msra.mxu1 %v1720_v9 }
 0x375   : > { %1995 = vmatpush.msra.mxu2 %v1619_v10  ;;  %2017 = vmatpush.msra.mxu3 %v1721_v12 }
 0x376   : > { %1950 = vmatpush.msra.mxu0 %v1612_v13  ;;  %1972 = vmatpush.msra.mxu1 %v1714_v14 }
 0x377   : > { %1996 = vmatpush.msra.mxu2 %v1613_v15  ;;  %2018 = vmatpush.msra.mxu3 %v1715_v18 }
 0x378   : > { %1951 = vmatpush.msra.mxu0 %v1606_v41  ;;  %1973 = vmatpush.msra.mxu1 %v1708_v19 }
 0x379   : > { %1997 = vmatpush.msra.mxu2 %v1607_v11  ;;  %2019 = vmatpush.msra.mxu3 %v1709_v21 }
 0x37a   : > { %1868 = vmatmul.f32.vlgmr.msrb.gmra.mxu0 %v2937_v16  ;;  %1974 = vmatpush.msra.mxu1 %v1702_v22 }
 0x37b   : > { %1952 = vmatpush.msra.mxu0 %v1600_v23  ;;  %1998 = vmatpush.msra.mxu2 %v1601_v24 }
 0x37c   : > { %2020 = vmatpush.msra.mxu3 %v1703_v25  ;;  %1891 = vmatmul.f32.vlgmr.msrb.gmra.mxu1 %v2840_v29 }
 0x37d   : > { %1953 = vmatpush.msra.mxu0 %v1594_v26  ;;  %1975 = vmatpush.msra.mxu1 %v1696_v28 }
 0x37e   : > { %1999 = vmatpush.msra.mxu2 %v1595_v5  ;;  %2021 = vmatpush.msra.mxu3 %v1697_v7 }
 0x37f   : > { %1954 = vmatpush.msra.mxu0 %v1588_v30  ;;  %1976 = vmatpush.msra.mxu1 %v1690_v31 }
 0x380   : > { %2000 = vmatpush.msra.mxu2 %v1589_v34  ;;  %2022 = vmatpush.msra.mxu3 %v1691_v35 }
 0x381   : > { %1955 = vmatpush.msra.mxu0 %v1582_v37  ;;  %1977 = vmatpush.msra.mxu1 %v1684_v0 }
 0x382   : > { %2001 = vmatpush.msra.mxu2 %v1583_v6  ;;  %2023 = vmatpush.msra.mxu3 %v1685_v39 }
 0x383   : > { %1871 = vmatmul.f32.gmra.mxu0 %v2941_v36  ;;  %1978 = vmatpush.msra.mxu1 %v1678_v40 }
 0x384   : > { %1956 = vmatpush.msra.mxu0 %v1576_v20  ;;  %2002 = vmatpush.msra.mxu2 %v1577_v42 }
 0x385   : > { %2024 = vmatpush.msra.mxu3 %v1679_v33  ;;  %1894 = vmatmul.f32.gmra.mxu1 %v2834_v27 }
 0x386   : > { %1957 = vmatpush.msra.mxu0 %v1570_v43  ;;  %1979 = vmatpush.msra.mxu1 %v1672_v44 }
 0x387   : > { %2003 = vmatpush.msra.mxu2 %v1571_v45  ;;  %2025 = vmatpush.msra.mxu3 %v1673_v46 }
 0x388   : > { %1958 = vmatpush.msra.mxu0 %v1564_v48  ;;  %1980 = vmatpush.msra.mxu1 %v1666_v49 }
 0x389   : > { %2004 = vmatpush.msra.mxu2 %v1565_v50  ;;  %2026 = vmatpush.msra.mxu3 %v1667_v51 }
 0x38a   : > { %1959 = vmatpush.msra.mxu0 %v1558_v17  ;;  %1981 = vmatpush.msra.mxu1 %v1660_v32 }
 0x38b   : > { %2005 = vmatpush.msra.mxu2 %v1559_v52  ;;  %2027 = vmatpush.msra.mxu3 %v1661_v53 }
 0x38c   : > { %1960 = vmatmul.f32.vlgmr.msra.gmra.mxu0 %v2937_v16  ;;  %2006 = vmatmul.f32.vlgmr.msra.gmra.mxu2 %v2937_v16  ;;  %v2968_v16 = vld [vmem:[%s3041_s18] sm:$0x3f] }
 0x38d   : > { %1982 = vmatpush.msra.mxu1 %v1654_v47  ;;  %2028 = vmatpush.msra.mxu3 %v1655_v54  ;;  %v1748_v61 = vperm.slane %v2968_v16, 0  ;;  %v1751_v38 = vperm.slane %v2968_v16, 3  ;;  %v1749_v5 = vperm.slane %v2968_v16, 1  ;;  %v1752_v31 = vperm.slane %v2968_v16, 4 }
 0x38e   : > { %1983 = vmatmul.f32.vlgmr.msra.gmra.mxu1 %v2840_v29  ;;  %2029 = vmatmul.f32.vlgmr.msra.gmra.mxu3 %v2840_v29  ;;  %v1753_v51 = vperm.slane %v2968_v16, 5 }
 0x394   : > { %1963 = vmatmul.f32.gmra.mxu0 %v2941_v36  ;;  %2009 = vmatmul.f32.gmra.mxu2 %v2941_v36 }
 0x396   : > { %1986 = vmatmul.f32.gmra.mxu1 %v2834_v27  ;;  %2032 = vmatmul.f32.gmra.mxu3 %v2834_v27 }
 0x3d7   : > { %v1823_v55 = vpop.f32.mrf.mxu2 }
 0x3d8   : > { %v1824_v34 = vadd.f32 %v1823_v55, %v1749_v5 }
 0x3da   : > { %v1846_v56 = vpop.f32.mrf.mxu3 }
 0x3db   : > { %v1847_v39 = vadd.f32 %v1846_v56, %v1824_v34 }
 0x3e0   : > { %v1826_v57 = vpop.f32.mrf.mxu2 }
 0x3e1   : > { %v1777_v59 = vpop.f32.mrf.mxu0  ;;  %v1827_v43 = vadd.f32 %v1826_v57, %v1749_v5 }
 0x3e2   : > { %v1778_v36 = vadd.f32 %v1777_v59, %v1748_v61 }
 0x3e3   : > { %v1849_v60 = vpop.f32.mrf.mxu3 }
 0x3e4   : > { %v1850_v32 = vadd.f32 %v1849_v60, %v1827_v43 }
 0x3e5   : > { %v1800_v62 = vpop.f32.mrf.mxu1 }
 0x3e6   : > { %v1801_v2 = vadd.f32 %v1800_v62, %v1778_v36 }
 0x3e9   : > { %v1915_v63 = vpop.f32.mrf.mxu2 }
 0x3ea   : > { %v1916_v58 = vadd.f32 %v1915_v63, %v1751_v38 }
 0x3ec   : > { %v1938_v1 = vpop.f32.mrf.mxu3 }
 0x3ed   : > { %v1780_v3 = vpop.f32.mrf.mxu0  ;;  %v1939_v4 = vadd.f32 %v1938_v1, %v1916_v58 }
 0x3ee   : > { %v1781_v12 = vadd.f32 %v1780_v3, %v1748_v61 }
 0x3ef   : > { %v2036_v8 = vadd.f32 %v1939_v4, %v1801_v2 }
 0x3f0   : > { %v1803_v9 = vpop.f32.mrf.mxu1 }
 0x3f1   : > { %v2301_v10 = vmul.f32 -1.442695, %v2036_v8  ;;  %v1804_v18 = vadd.f32 %v1803_v9, %v1781_v12 }
 0x3f3   : > { %2410 = vpow2.f32 %v2301_v10  ;;  %v1918_v13 = vpop.f32.mrf.mxu2 }
 0x3f4   : > { %v1919_v14 = vadd.f32 %v1918_v13, %v1751_v38  ;;  %v1750_v38 = vperm.slane %v2968_v16, 2 }
 0x3f6   : > { %v1941_v15 = vpop.f32.mrf.mxu3 }
 0x3f7   : > { %v1869_v41 = vpop.f32.mrf.mxu0  ;;  %v1942_v19 = vadd.f32 %v1941_v15, %v1919_v14 }
 0x3f8   : > { %v1870_v4 = vadd.f32 %v1869_v41, %v1750_v38 }
 0x3f9   : > { %v2411_v11 = vpop.eup %2410  ;;  %v2037_v21 = vadd.f32 %v1942_v19, %v1804_v18  ;;  %v2972_v22 = vpop.f32.mrf.mxu1 }
 0x3fa   : > { %v2044_v24 = vadd.f32 1.0, %v2411_v11  ;;  %v1893_v18 = vadd.f32 %v2972_v22, %v1870_v4 }
 0x3fb   : > { %v2302_v23 = vmul.f32 -1.442695, %v2037_v21 }
 0x3fc   : > { %v2057_v55 = vand.u32 2147483648, %v2044_v24  ;;  %vm2051_vm2 = vweird.f32 %v2044_v24  ;;  %v2055_v59 = vand.u32 2147483647, %v2044_v24 }
 0x3fd   : > { %2412 = vpow2.f32 %v2302_v23 }
 0x3fe   : > { %2414 = vrcp.f32 %v2044_v24  ;;  %v2058_v1 = vor.u32 1.1754944e-38, %v2057_v55  ;;  %vm2056_vm4 = vcmp.eq.f32.partialorder %v2055_v59, 8.507059e+37 }
 0x400   : > { %v2974_v25 = vpop.f32.mrf.mxu0 }
 0x402   : > { %v2976_v26 = vpop.f32.mrf.mxu1 }
 0x403   : > { %v2413_v28 = vpop.eup %2412 }
 0x404   : > { %v2979_v7 = vadd.f32 1.0, %v2413_v28  ;;  %v2415_v30 = vpop.eup %2414 }
 0x405   : > { %v2047_v37 = vmul.f32 %v2415_v30, %v2044_v24  ;;  %vm2052_vm1 = vweird.f32 %v2415_v30 }
 0x406   : > { %2416 = vrcp.f32 %v2979_v7  ;;  %vm2053_vm3 = vmor %vm2051_vm2, %vm2052_vm1  ;;  %v2072_v9 = vand.u32 2147483648, %v2979_v7  ;;  %vm2066_vm6 = vweird.f32 %v2979_v7  ;;  %v2070_v16 = vand.u32 2147483647, %v2979_v7 }
 0x407   : > { %v2048_v20 = vsub.f32 1.0, %v2047_v37 }
 0x408   : > { %v2073_v41 = vor.u32 1.1754944e-38, %v2072_v9  ;;  %vm2071_vm8 = vcmp.eq.f32.partialorder %v2070_v16, 8.507059e+37 }
 0x409   : > { %v1961_v35 = vpop.f32.mrf.mxu0  ;;  %v2049_v46 = vmul.f32 %v2415_v30, %v2048_v20 }
 0x40a   : > { %v1962_v0 = vadd.f32 %v1961_v35, %v1752_v31 }
 0x40b   : > { %v1984_v6 = vpop.f32.mrf.mxu1  ;;  %v2050_v53 = vadd.f32 %v2415_v30, %v2049_v46 }
 0x40c   : > { %v1985_v40 = vadd.f32 %v1984_v6, %v1962_v0  ;;  %v2417_v42 = vpop.eup %2416 }
 0x40d   : > { %v2062_v48 = vmul.f32 %v2417_v42, %v2979_v7  ;;  %v2054_v63 = vsel %vm2053_vm3, %v2415_v30, %v2050_v53  ;;  %vm2067_vm5 = vweird.f32 %v2417_v42  ;;  %v1873_v30 = vadd.f32 %v2974_v25, %v1750_v38 }
 0x40e   : > { %v2076_v33 = vadd.f32 %v1985_v40, %v1847_v39  ;;  %v2059_v2 = vsel %vm2056_vm4, %v2058_v1, %v2054_v63  ;;  %vm2068_vm7 = vmor %vm2066_vm6, %vm2067_vm5 }
 0x40f   : > { %v2007_v49 = vpop.f32.mrf.mxu2  ;;  %v2063_v47 = vsub.f32 1.0, %v2062_v48  ;;  %v1896_v0 = vadd.f32 %v2976_v26, %v1873_v30 }
 0x410   : > { %v2303_v44 = vmul.f32 -1.442695, %v2076_v33  ;;  %v2008_v57 = vadd.f32 %v2007_v49, %v1753_v51 }
 0x411   : > { %v1964_v45 = vpop.f32.mrf.mxu0  ;;  %v2030_v54 = vpop.f32.mrf.mxu3  ;;  %v2064_v58 = vmul.f32 %v2417_v42, %v2063_v47 }
 0x412   : > { %2418 = vpow2.f32 %v2303_v44  ;;  %v1965_v50 = vadd.f32 %v1964_v45, %v1752_v31  ;;  %v2031_v60 = vadd.f32 %v2030_v54, %v2008_v57 }
 0x413   : > { %v1987_v17 = vpop.f32.mrf.mxu1  ;;  %v2065_v8 = vadd.f32 %v2417_v42, %v2064_v58 }
 0x414   : > { %v1988_v52 = vadd.f32 %v1987_v17, %v1965_v50  ;;  %v2116_v10 = vmul.f32 %v2059_v2, %v2031_v60 }
 0x415   : > { %v2069_v11 = vsel %vm2068_vm7, %v2417_v42, %v2065_v8 }
 0x416   : > { %v2077_v56 = vadd.f32 %v1988_v52, %v1850_v32  ;;  %v2118_v23 = vadd.f32 %v2116_v10, %v1893_v18  ;;  %v2074_v5 = vsel %vm2071_vm8, %v2073_v41, %v2069_v11 }
 0x417   : > { %v2010_v3 = vpop.f32.mrf.mxu2 }
 0x418   : > { %v2419_v61 = vpop.eup %2418  ;;  %v2304_v62 = vmul.f32 -1.442695, %v2077_v56  ;;  %v2011_v12 = vadd.f32 %v2010_v3, %v1753_v51 }
 0x419   : > { %v2084_v36 = vadd.f32 1.0, %v2419_v61  ;;  %v2033_v14 = vpop.f32.mrf.mxu3 }
 0x41a   : > { %2420 = vpow2.f32 %v2304_v62  ;;  %v2034_v24 = vadd.f32 %v2033_v14, %v2011_v12 }
 0x41b   : > { %2422 = vrcp.f32 %v2084_v36  ;;  %v2097_v31 = vand.u32 2147483648, %v2084_v36  ;;  %v2095_v34 = vand.u32 2147483647, %v2084_v36  ;;  %vm2091_vm10 = vweird.f32 %v2084_v36 }
 0x41c   : > { %v2117_v35 = vmul.f32 %v2074_v5, %v2034_v24 }
 0x41d   : > { %v2098_v6 = vor.u32 1.1754944e-38, %v2097_v31  ;;  %vm2096_vm12 = vcmp.eq.f32.partialorder %v2095_v34, 8.507059e+37 }
 0x41e   : > { %v2119_v42 = vadd.f32 %v2117_v35, %v1896_v0 }
 0x420   : > { %v2421_v13 = vpop.eup %2420 }
 0x421   : > { %v2423_v15 = vpop.eup %2422  ;;  %v2085_v19 = vadd.f32 1.0, %v2421_v13 }
 0x422   : > { %v2087_v21 = vmul.f32 %v2423_v15, %v2084_v36  ;;  %vm2092_vm9 = vweird.f32 %v2423_v15 }
 0x423   : > { %2424 = vrcp.f32 %v2085_v19  ;;  %vm2093_vm11 = vmor %vm2091_vm10, %vm2092_vm9  ;;  %v2112_v44 = vand.u32 2147483648, %v2085_v19  ;;  %v2110_v45 = vand.u32 2147483647, %v2085_v19  ;;  %vm2106_vm14 = vweird.f32 %v2085_v19 }
 0x424   : > { %v2088_v28 = vsub.f32 1.0, %v2087_v21  ;;  %2426 = vtanh.f32 %v2118_v23 }
 0x425   : > { %2428 = vtanh.f32 %v2119_v42  ;;  %v2113_v51 = vor.u32 1.1754944e-38, %v2112_v44  ;;  %vm2111_vm0 = vcmp.eq.f32.partialorder %v2110_v45, 8.507059e+37 }
 0x426   : > { %v2089_v7 = vmul.f32 %v2423_v15, %v2088_v28 }
 0x428   : > { %v2090_v22 = vadd.f32 %v2423_v15, %v2089_v7 }
 0x429   : > { %v2425_v37 = vpop.eup %2424 }
 0x42a   : > { %v2094_v39 = vsel %vm2093_vm11, %v2423_v15, %v2090_v22  ;;  %v2102_v40 = vmul.f32 %v2425_v37, %v2085_v19  ;;  %v2427_v43 = vpop.eup %2426  ;;  %vm2107_vm13 = vweird.f32 %v2425_v37 }
 0x42b   : > { %v2099_v20 = vsel %vm2096_vm12, %v2098_v6, %v2094_v39  ;;  %vm2108_vm15 = vmor %vm2106_vm14, %vm2107_vm13  ;;  %v2429_v53 = vpop.eup %2428 }
 0x42c   : > { %v2122_v33 = vsub.f32 1.0, %v2099_v20  ;;  %v2103_v25 = vsub.f32 1.0, %v2102_v40  ;;  %v2126_v48 = vmul.f32 %v2099_v20, %v2840_v29 }
 0x42e   : > { %v2124_v46 = vmul.f32 %v2427_v43, %v2122_v33  ;;  %v2104_v49 = vmul.f32 %v2425_v37, %v2103_v25 }
 0x430   : > { %v2128_v50 = vadd.f32 %v2126_v48, %v2124_v46  ;;  %v2105_v26 = vadd.f32 %v2425_v37, %v2104_v49 }
 0x432   : > { %2130 = vst [vmem:[#allocation11] sm:$0xff] %v2128_v50  ;;  %v2109_v17 = vsel %vm2108_vm15, %v2425_v37, %v2105_v26 }
 0x433   : > { %v2114_v32 = vsel %vm2111_vm0, %v2113_v51, %v2109_v17 }
 0x434   : > { %v2123_v52 = vsub.f32 1.0, %v2114_v32  ;;  %v2127_v54 = vmul.f32 %v2114_v32, %v2834_v27 }
 0x436   : > { %v2125_v47 = vmul.f32 %v2429_v53, %v2123_v52 }
 0x438   : > { %v2129_v55 = vadd.f32 %v2127_v54, %v2125_v47 }
 0x43a   : > { %2131 = vst [vmem:[#allocation11 + $0x8] sm:$0xff] %v2129_v55 }
 0x43b PF: > { %s3042_s30 = sld [smem:[#allocation16_spill]]  ;;  %s2645_s14 = smov [#allocation11]  }
 0x43c   : > { %s3044_s22 = sld [smem:[#allocation21_spill]]  ;;  %s2137_s12 = sshll.u32 %s2645_s14, 4  ;;  %s2138_s12 = int_to_ptr.vmem [resolvable:$true] %s2137_s12 }
 0x43d   : > { %s2646_s25 = smov 128   ;;  %s2647_s8 = smov 8  }
 0x441   : > { %s3043_s27 = sadd.s32 4294967295, %s3042_s30  }
 0x442   : > { %p2352_p0 = scmp.eq.s32.totalorder %s3043_s27, 5  ;;  %s2139_s29 = sshll.u32 %s3044_s22, 4  ;;  %s2140_s29 = int_to_ptr.hbm [resolvable:$true] %s2139_s29 }
 0x444   : > { %2328 = dma.vmem_to_hbm [thread:$0]  (%p2352_p0), %s2138_s12, 256, %s2140_s29, [#allocation5], %s2646_s25, %s2646_s25, %s2647_s8  }
 0x445   : > { %2611 = dma.done.wait (%p2352_p0), [#allocation5], 256  }
 0x446   : > { %2613 = vsyncadd (%p2352_p0), [#allocation5], 4294967040 }
 0x447 PF: > { %s3045_s26 = sld [smem:[#allocation16_spill]]  ;;  %s3046_s21 = smov %s2624_s23 }
 0x448   : > { %s3047_s22 = smov %s2628_s24  ;;  %s3048_s23 = smov %s3051_s19 }
 0x449   : > { %s3049_s24 = smov %s3055_s20 }
 0x44d   : > { %s26_s25 = sadd.s32 1, %s3045_s26  }
 0x44e   : > { %p23_p1 = scmp.ge.s32.totalorder %s26_s25, 8  }
 0x450   :  { %25 = sbr.rel (!%p23_p1) target bundleno = 12 (0xc), region = 130 }
 0x455   :  { %2156 = vsyncpa [#allocation4], 1 }
 0x456   :  { %2158 = vsyncpa [#allocation4 + $0x1], 1 }
 0x457   :  { %2159 = vsyncpa [#allocation7], 1 }
 0x458   :  { %2160 = vsyncpa [#allocation10], 1 }
 0x459   :  { %2161 = vsyncpa [#allocation5], 1 }
 0x45a   :  { %2163 = vsyncpa [#allocation5 + $0x1], 1 }

</bundles_post_ra>
